<compile_context>
chip_gen: v6e
topology: v6e:2x2x1
jax: 0.10.0
libtpu: 0.0.40
codegen_flags: <defaults>
</compile_context>

<pallas_src>
import jax
import jax.numpy as jnp
from jax.experimental import pallas as pl
from jax.experimental.pallas import tpu as pltpu

Z_DIM = 2
IN_DIM = 784
HID = 100

HID_PAD = 128    # hidden lanes (100 -> 128)
Z_PAD = 128      # z lanes (2 -> 128)


def _round_up(n, m):
    return ((n + m - 1) // m) * m


def _softplus(x):
    # Numerically-stable softplus using only exp/log (guaranteed Mosaic lowering).
    return jnp.where(x > 20.0, x, jnp.log(1.0 + jnp.exp(jnp.minimum(x, 20.0))))


def _elu(x):
    # torch nn.ELU(alpha=1): x if x > 0 else exp(x) - 1
    return jnp.where(x > 0.0, x, jnp.exp(jnp.minimum(x, 0.0)) - 1.0)


def vae_kernel(
    x_ref, noise_ref, eps_ref,
    we1_ref, be1_ref, we2_ref, be2_ref, we3_ref, be3_ref,
    wd1_ref, bd1_ref, wd2_ref, bd2_ref, wd3_ref, bd3_ref,
    xhat_ref, y_ref, ml_ref, kl_ref,
):
    f32 = jnp.float32
    bf16 = jnp.bfloat16
    tb = x_ref.shape[0]

    # ---- input preprocessing + noise (in-place += in torch -> target is noisy) ----
    x_hat = (x_ref[...] + 1.0) * 0.5 + noise_ref[...]        # (TB, 784) f32
    xhat_ref[...] = x_hat

    # ---- encoder: 784 -> 100 (tanh) -> 100 (ELU) -> fused [mean | std-arg] ----
    h1 = jnp.tanh(
        jnp.dot(x_hat.astype(bf16), we1_ref[...], preferred_element_type=f32)
        + be1_ref[...]
    )
    h2 = _elu(
        jnp.dot(h1.astype(bf16), we2_ref[...], preferred_element_type=f32)
        + be2_ref[...]
    )
    ms = (
        jnp.dot(h2.astype(bf16), we3_ref[...], preferred_element_type=f32)
        + be3_ref[...]
    )                                                        # (TB, 256)
    mean = ms[:, :Z_PAD]                                     # padded lanes exactly 0
    std = 1e-6 + _softplus(ms[:, Z_PAD:])                    # padded lanes = 1e-6+log2

    # ---- reparameterization (padded eps/mean lanes are zero -> padded z is zero) ----
    z = mean + std * eps_ref[...]

    # ---- decoder: z -> 100 (tanh) -> 100 (ELU) -> 784 logits ----
    d1 = jnp.tanh(
        jnp.dot(z.astype(bf16), wd1_ref[...], preferred_element_type=f32)
        + bd1_ref[...]
    )
    d2 = _elu(
        jnp.dot(d1.astype(bf16), wd2_ref[...], preferred_element_type=f32)
        + bd2_ref[...]
    )
    logits = (
        jnp.dot(d2.astype(bf16), wd3_ref[...], preferred_element_type=f32)
        + bd3_ref[...]
    )                                                        # (TB, 784) f32

    # ---- sigmoid + log-sigmoid sharing a single exp over the big tensor ----
    neg_l = -logits
    t = jnp.exp(jnp.minimum(neg_l, 20.0))
    sp_neg = jnp.where(neg_l > 20.0, neg_l, jnp.log(1.0 + t))   # softplus(-l)
    y = pl.reciprocal(1.0 + t, approx=True)                     # sigmoid(l)
    y_ref[...] = y.astype(y_ref.dtype)                          # bf16 writeback

    # ---- per-row Bernoulli log-likelihood in logit space (no padded lanes) ----
    #   x*log(y) + (1-x)*log(1-y) = -softplus(-l) - (1-x)*l
    ml_ref[...] = jnp.sum(-sp_neg - (1.0 - x_hat) * logits, axis=1, keepdims=True)

    # ---- per-row KL(q || N(0,I)) over the real z lanes only (cheap 128-lane mask) ----
    lane_z = jax.lax.broadcasted_iota(jnp.int32, (tb, Z_PAD), 1)
    var = std * std
    kl_elem = jnp.where(
        lane_z < Z_DIM, mean * mean + var - jnp.log(1e-7 + var) - 1.0, 0.0
    )
    kl_ref[...] = 0.5 * jnp.sum(kl_elem, axis=1, keepdims=True)


def pack_params(params):
    """Pad weights to lane-dense shapes; wide matrices stored bf16 for the MXU."""
    (we1, be1, we2, be2, we3, be3, wd1, bd1, wd2, bd2, wd3, bd3) = params

    def pad_w(w, rows, cols, dtype=jnp.bfloat16):
        return jnp.pad(w, ((0, rows - w.shape[0]), (0, cols - w.shape[1]))).astype(dtype)

    def pad_b(b, cols):
        b2 = jnp.reshape(b, (1, -1))
        return jnp.pad(b2, ((0, 0), (0, cols - b2.shape[1]))).astype(jnp.float32)

    we1_p = pad_w(we1, IN_DIM, HID_PAD)            # (784, 128) bf16 (rows unpadded)
    be1_p = pad_b(be1, HID_PAD)
    we2_p = pad_w(we2, HID_PAD, HID_PAD)           # (128, 128) bf16
    be2_p = pad_b(be2, HID_PAD)

    # Fused mean|std head: mean cols -> lanes [0, Z_DIM), std-arg -> [Z_PAD, Z_PAD+Z_DIM)
    we3_f = jnp.zeros((HID_PAD, 2 * Z_PAD), jnp.float32)
    we3_f = we3_f.at[:HID, :Z_DIM].set(we3[:, :Z_DIM])
    we3_f = we3_f.at[:HID, Z_PAD:Z_PAD + Z_DIM].set(we3[:, Z_DIM:])
    we3_p = we3_f.astype(jnp.bfloat16)             # (128, 256) bf16
    be3_f = jnp.zeros((1, 2 * Z_PAD), jnp.float32)
    be3_f = be3_f.at[0, :Z_DIM].set(be3[:Z_DIM])
    be3_f = be3_f.at[0, Z_PAD:Z_PAD + Z_DIM].set(be3[Z_DIM:])

    wd1_p = pad_w(wd1, Z_PAD, HID_PAD)             # (128, 128) bf16
    bd1_p = pad_b(bd1, HID_PAD)
    wd2_p = pad_w(wd2, HID_PAD, HID_PAD)           # (128, 128) bf16
    bd2_p = pad_b(bd2, HID_PAD)
    wd3_p = pad_w(wd3, HID_PAD, IN_DIM)            # (128, 784) bf16 (cols unpadded)
    bd3_p = pad_b(bd3, IN_DIM)                     # (1, 784)

    return (we1_p, be1_p, we2_p, be2_p, we3_p, be3_f,
            wd1_p, bd1_p, wd2_p, bd2_p, wd3_p, bd3_p)


def _choose_tb(batch):
    # >=2 grid steps when possible (pipelining + megacore sharding on 2-TC v7x),
    # 16-row alignment (bf16 output sublane tile), cap at 256 rows so the
    # double-buffered working set stays comfortably inside every generation's VMEM.
    tb = -(-batch // 2)
    tb = _round_up(max(tb, 16), 16)
    return min(256, tb)


@jax.jit
def vae_forward(x, noise, eps, packed):
    B = x.shape[0]
    TB = _choose_tb(B)
    grid = (pl.cdiv(B, TB),)   # non-dividing last block: OOB reads unused, OOB writes dropped

    # Only the tiny eps tensor gets lane-padded (negligible traffic); x / noise /
    # x_hat / y stay at their natural 784-lane HBM layout.
    eps_p = jnp.pad(eps, ((0, 0), (0, Z_PAD - Z_DIM)))

    def row_spec(cols):
        return pl.BlockSpec((TB, cols), lambda i: (i, 0))

    def const_spec(shape):
        return pl.BlockSpec(shape, lambda i: (0, 0))

    weight_specs = [const_spec(p.shape) for p in packed]

    x_hat, y, ml_rows, kl_rows = pl.pallas_call(
        vae_kernel,
        grid=grid,
        in_specs=[row_spec(IN_DIM), row_spec(IN_DIM), row_spec(Z_PAD)] + weight_specs,
        out_specs=(
            row_spec(IN_DIM),                          # x_hat (f32)
            row_spec(IN_DIM),                          # y     (bf16)
            pl.BlockSpec((TB, 1), lambda i: (i, 0)),   # per-row log-likelihood
            pl.BlockSpec((TB, 1), lambda i: (i, 0)),   # per-row KL
        ),
        out_shape=(
            jax.ShapeDtypeStruct((B, IN_DIM), jnp.float32),
            jax.ShapeDtypeStruct((B, IN_DIM), jnp.bfloat16),
            jax.ShapeDtypeStruct((B, 1), jnp.float32),
            jax.ShapeDtypeStruct((B, 1), jnp.float32),
        ),
        compiler_params=pltpu.CompilerParams(
            dimension_semantics=("parallel",),
            vmem_limit_bytes=40 * 1024 * 1024,
        ),
    )(x, noise, eps_p, *packed)

    # Final (cheap) scalar reductions in the wrapper.
    ml = jnp.mean(ml_rows[:, 0])
    kl = jnp.mean(kl_rows[:, 0])
    elbo = ml - kl
    return x_hat, y, -elbo, -ml, kl


# ------------------------- pure-JAX reference (f32) -------------------------
def vae_reference(x, noise, eps, params):
    we1, be1, we2, be2, we3, be3, wd1, bd1, wd2, bd2, wd3, bd3 = params
    x_hat = (x + 1.0) / 2.0 + noise                      # torch in-place +=
    h1 = jnp.tanh(x_hat @ we1 + be1)
    h2 = jax.nn.elu(h1 @ we2 + be2)
    out = h2 @ we3 + be3
    mean = out[:, :Z_DIM]
    std = 1e-6 + jax.nn.softplus(out[:, Z_DIM:])
    z = mean + std * eps
    d1 = jnp.tanh(z @ wd1 + bd1)
    d2 = jax.nn.elu(d1 @ wd2 + bd2)
    y = jax.nn.sigmoid(d2 @ wd3 + bd3)
    ml = jnp.mean(jnp.sum(
        x_hat * jnp.log(1e-7 + y) + (1.0 - x_hat) * jnp.log(1.0 - y + 1e-7), axis=1))
    kl = jnp.mean(0.5 * jnp.sum(
        mean ** 2 + std ** 2 - jnp.log(1e-7 + std ** 2) - 1.0, axis=1))
    elbo = ml - kl
    return x_hat, y, -elbo, -ml, kl


def _linear_params(key, fan_in, fan_out):
    # Deterministic init mimicking torch.nn.Linear (uniform +/- 1/sqrt(fan_in)).
    kw, kb = jax.random.split(key)
    bound = 1.0 / (fan_in ** 0.5)
    w = jax.random.uniform(kw, (fan_in, fan_out), jnp.float32, -bound, bound)
    b = jax.random.uniform(kb, (fan_out,), jnp.float32, -bound, bound)
    return w, b


def init_params(key):
    keys = jax.random.split(key, 6)
    we1, be1 = _linear_params(keys[0], IN_DIM, HID)
    we2, be2 = _linear_params(keys[1], HID, HID)
    we3, be3 = _linear_params(keys[2], HID, 2 * Z_DIM)
    wd1, bd1 = _linear_params(keys[3], Z_DIM, HID)
    wd2, bd2 = _linear_params(keys[4], HID, HID)
    wd3, bd3 = _linear_params(keys[5], HID, IN_DIM)
    return (we1, be1, we2, be2, we3, be3, wd1, bd1, wd2, bd2, wd3, bd3)


if __name__ == "__main__":
    B = 64
    key = jax.random.PRNGKey(0)
    k_params, k_x, k_noise, k_eps = jax.random.split(key, 4)

    params = init_params(k_params)
    packed = pack_params(params)

    # Inputs in [-1, 1] like pre-scaled MNIST pixels (module maps them to [0,1]).
    x = jax.random.uniform(k_x, (B, IN_DIM), jnp.float32, -1.0, 1.0)
    # TODO(synk): torch.randn noise / epsilon are sampled host-side and passed in
    # (the PyTorch module samples them internally each forward).
    noise = jax.random.normal(k_noise, (B, IN_DIM), jnp.float32) / 3.0
    eps = jax.random.normal(k_eps, (B, Z_DIM), jnp.float32)

    outs = vae_forward(x, noise, eps, packed)
    jax.block_until_ready(outs)
    x_hat, y, neg_elbo, neg_ml, kl = outs

    # Sanity-check against the f32 reference (bf16 weights / bf16 y -> loose tol).
    rx_hat, ry, rneg_elbo, rneg_ml, rkl = vae_reference(x, noise, eps, params)
    assert x_hat.shape == (B, IN_DIM)
    assert y.shape == (B, IN_DIM)
    assert bool(jnp.allclose(x_hat, rx_hat, atol=1e-5))
    assert bool(jnp.allclose(y.astype(jnp.float32), ry, atol=3e-2))
    for got, ref in ((neg_elbo, rneg_elbo), (neg_ml, rneg_ml), (kl, rkl)):
        assert bool(jnp.isfinite(got))
        assert abs(float(got) - float(ref)) <= 3e-2 * (1.0 + abs(float(ref)))

    print("KERNEL_OK")
</pallas_src>

<mosaic_0001>
module attributes {stable_mosaic.version = 11 : i64} {
  func.func @vae_kernel(%arg0: i32, %arg1: memref<32x784xf32, #tpu.memory_space<vmem>>, %arg2: memref<32x784xf32, #tpu.memory_space<vmem>>, %arg3: memref<32x128xf32, #tpu.memory_space<vmem>>, %arg4: memref<784x128xbf16, #tpu.memory_space<vmem>>, %arg5: memref<1x128xf32, #tpu.memory_space<vmem>>, %arg6: memref<128x128xbf16, #tpu.memory_space<vmem>>, %arg7: memref<1x128xf32, #tpu.memory_space<vmem>>, %arg8: memref<128x256xbf16, #tpu.memory_space<vmem>>, %arg9: memref<1x256xf32, #tpu.memory_space<vmem>>, %arg10: memref<128x128xbf16, #tpu.memory_space<vmem>>, %arg11: memref<1x128xf32, #tpu.memory_space<vmem>>, %arg12: memref<128x128xbf16, #tpu.memory_space<vmem>>, %arg13: memref<1x128xf32, #tpu.memory_space<vmem>>, %arg14: memref<128x784xbf16, #tpu.memory_space<vmem>>, %arg15: memref<1x784xf32, #tpu.memory_space<vmem>>, %arg16: memref<32x784xf32, #tpu.memory_space<vmem>>, %arg17: memref<32x784xbf16, #tpu.memory_space<vmem>>, %arg18: memref<32x1xf32, #tpu.memory_space<vmem>>, %arg19: memref<32x1xf32, #tpu.memory_space<vmem>>) attributes {dimension_semantics = [#tpu.dimension_semantics<parallel>], iteration_bounds = array<i64: 2>, scalar_prefetch = 0 : i64, scratch_operands = 0 : i64, tpu.core_type = #tpu.core_type<tc>, window_params = [{transform_indices = @transform_0, window_bounds = array<i64: 32, 784>}, {transform_indices = @transform_1, window_bounds = array<i64: 32, 784>}, {transform_indices = @transform_2, window_bounds = array<i64: 32, 128>}, {pipeline_mode = #tpu.pipeline_mode<synchronous>, transform_indices = @transform_3, window_bounds = array<i64: 784, 128>}, {pipeline_mode = #tpu.pipeline_mode<synchronous>, transform_indices = @transform_4, window_bounds = array<i64: 1, 128>}, {pipeline_mode = #tpu.pipeline_mode<synchronous>, transform_indices = @transform_5, window_bounds = array<i64: 128, 128>}, {pipeline_mode = #tpu.pipeline_mode<synchronous>, transform_indices = @transform_6, window_bounds = array<i64: 1, 128>}, {pipeline_mode = #tpu.pipeline_mode<synchronous>, transform_indices = @transform_7, window_bounds = array<i64: 128, 256>}, {pipeline_mode = #tpu.pipeline_mode<synchronous>, transform_indices = @transform_8, window_bounds = array<i64: 1, 256>}, {pipeline_mode = #tpu.pipeline_mode<synchronous>, transform_indices = @transform_9, window_bounds = array<i64: 128, 128>}, {pipeline_mode = #tpu.pipeline_mode<synchronous>, transform_indices = @transform_10, window_bounds = array<i64: 1, 128>}, {pipeline_mode = #tpu.pipeline_mode<synchronous>, transform_indices = @transform_11, window_bounds = array<i64: 128, 128>}, {pipeline_mode = #tpu.pipeline_mode<synchronous>, transform_indices = @transform_12, window_bounds = array<i64: 1, 128>}, {pipeline_mode = #tpu.pipeline_mode<synchronous>, transform_indices = @transform_13, window_bounds = array<i64: 128, 784>}, {pipeline_mode = #tpu.pipeline_mode<synchronous>, transform_indices = @transform_14, window_bounds = array<i64: 1, 784>}, {transform_indices = @transform_15, window_bounds = array<i64: 32, 784>}, {transform_indices = @transform_16, window_bounds = array<i64: 32, 784>}, {transform_indices = @transform_17, window_bounds = array<i64: 32, 1>}, {transform_indices = @transform_18, window_bounds = array<i64: 32, 1>}]} {
    %c0 = arith.constant 0 : index
    %c0_0 = arith.constant 0 : index
    %0 = vector.load %arg1[%c0, %c0_0] : memref<32x784xf32, #tpu.memory_space<vmem>>, vector<32x784xf32>
    %cst = arith.constant 1.000000e+00 : f32
    %1 = vector.broadcast %cst : f32 to vector<32x784xf32>
    %2 = arith.addf %0, %1 : vector<32x784xf32>
    %cst_1 = arith.constant 5.000000e-01 : f32
    %3 = vector.broadcast %cst_1 : f32 to vector<32x784xf32>
    %4 = arith.mulf %2, %3 : vector<32x784xf32>
    %c0_2 = arith.constant 0 : index
    %c0_3 = arith.constant 0 : index
    %5 = vector.load %arg2[%c0_2, %c0_3] : memref<32x784xf32, #tpu.memory_space<vmem>>, vector<32x784xf32>
    %6 = arith.addf %4, %5 : vector<32x784xf32>
    %c0_4 = arith.constant 0 : index
    %c0_5 = arith.constant 0 : index
    %7 = vector.load %arg16[%c0_4, %c0_5] : memref<32x784xf32, #tpu.memory_space<vmem>>, vector<32x784xf32>
    tpu.vector_store %arg16[%c0_4, %c0_5], %6 {strides = array<i32>} : memref<32x784xf32, #tpu.memory_space<vmem>>, vector<32x784xf32>,
    %8 = arith.truncf %6 : vector<32x784xf32> to vector<32x784xbf16>
    %c0_6 = arith.constant 0 : index
    %c0_7 = arith.constant 0 : index
    %9 = vector.load %arg4[%c0_6, %c0_7] : memref<784x128xbf16, #tpu.memory_space<vmem>>, vector<784x128xbf16>
    %cst_8 = arith.constant dense<0.000000e+00> : vector<32x128xf32>
    %10 = tpu.matmul %8, %9, %cst_8 {dimension_numbers = #tpu.dot_dimension_numbers<[1], [0], [0], [1], [0, 0, 1, 1], [], []>} : vector<32x784xbf16>, vector<784x128xbf16>, vector<32x128xf32> -> vector<32x128xf32>
    %c0_9 = arith.constant 0 : index
    %c0_10 = arith.constant 0 : index
    %11 = vector.load %arg5[%c0_9, %c0_10] : memref<1x128xf32, #tpu.memory_space<vmem>>, vector<1x128xf32>
    %12 = vector.broadcast %11 : vector<1x128xf32> to vector<32x128xf32>
    %13 = arith.addf %10, %12 : vector<32x128xf32>
    %14 = math.tanh %13 : vector<32x128xf32>
    %15 = arith.truncf %14 : vector<32x128xf32> to vector<32x128xbf16>
    %c0_11 = arith.constant 0 : index
    %c0_12 = arith.constant 0 : index
    %16 = vector.load %arg6[%c0_11, %c0_12] : memref<128x128xbf16, #tpu.memory_space<vmem>>, vector<128x128xbf16>
    %cst_13 = arith.constant dense<0.000000e+00> : vector<32x128xf32>
    %17 = tpu.matmul %15, %16, %cst_13 {dimension_numbers = #tpu.dot_dimension_numbers<[1], [0], [0], [1], [0, 0, 1, 1], [], []>} : vector<32x128xbf16>, vector<128x128xbf16>, vector<32x128xf32> -> vector<32x128xf32>
    %c0_14 = arith.constant 0 : index
    %c0_15 = arith.constant 0 : index
    %18 = vector.load %arg7[%c0_14, %c0_15] : memref<1x128xf32, #tpu.memory_space<vmem>>, vector<1x128xf32>
    %19 = vector.broadcast %18 : vector<1x128xf32> to vector<32x128xf32>
    %20 = arith.addf %17, %19 : vector<32x128xf32>
    %cst_16 = arith.constant 0.000000e+00 : f32
    %21 = vector.broadcast %cst_16 : f32 to vector<32x128xf32>
    %22 = arith.cmpf ogt, %20, %21 : vector<32x128xf32>
    %cst_17 = arith.constant 0.000000e+00 : f32
    %23 = vector.broadcast %cst_17 : f32 to vector<32x128xf32>
    %24 = arith.minimumf %20, %23 : vector<32x128xf32>
    %25 = math.exp %24 : vector<32x128xf32>
    %cst_18 = arith.constant 1.000000e+00 : f32
    %26 = vector.broadcast %cst_18 : f32 to vector<32x128xf32>
    %27 = arith.subf %25, %26 : vector<32x128xf32>
    %28 = arith.select %22, %20, %27 : vector<32x128xi1>, vector<32x128xf32>
    %29 = arith.truncf %28 : vector<32x128xf32> to vector<32x128xbf16>
    %c0_19 = arith.constant 0 : index
    %c0_20 = arith.constant 0 : index
    %30 = vector.load %arg8[%c0_19, %c0_20] : memref<128x256xbf16, #tpu.memory_space<vmem>>, vector<128x256xbf16>
    %cst_21 = arith.constant dense<0.000000e+00> : vector<32x256xf32>
    %31 = tpu.matmul %29, %30, %cst_21 {dimension_numbers = #tpu.dot_dimension_numbers<[1], [0], [0], [1], [0, 0, 1, 1], [], []>} : vector<32x128xbf16>, vector<128x256xbf16>, vector<32x256xf32> -> vector<32x256xf32>
    %c0_22 = arith.constant 0 : index
    %c0_23 = arith.constant 0 : index
    %32 = vector.load %arg9[%c0_22, %c0_23] : memref<1x256xf32, #tpu.memory_space<vmem>>, vector<1x256xf32>
    %33 = vector.broadcast %32 : vector<1x256xf32> to vector<32x256xf32>
    %34 = arith.addf %31, %33 : vector<32x256xf32>
    %35 = vector.extract_strided_slice %34 {offsets = [0, 0], sizes = [32, 128], strides = [1, 1]} : vector<32x256xf32> to vector<32x128xf32>
    %36 = vector.extract_strided_slice %34 {offsets = [0, 128], sizes = [32, 128], strides = [1, 1]} : vector<32x256xf32> to vector<32x128xf32>
    %cst_24 = arith.constant 2.000000e+01 : f32
    %37 = vector.broadcast %cst_24 : f32 to vector<32x128xf32>
    %38 = arith.cmpf ogt, %36, %37 : vector<32x128xf32>
    %cst_25 = arith.constant 2.000000e+01 : f32
    %39 = vector.broadcast %cst_25 : f32 to vector<32x128xf32>
    %40 = arith.minimumf %36, %39 : vector<32x128xf32>
    %41 = math.exp %40 : vector<32x128xf32>
    %cst_26 = arith.constant 1.000000e+00 : f32
    %42 = vector.broadcast %cst_26 : f32 to vector<32x128xf32>
    %43 = arith.addf %42, %41 : vector<32x128xf32>
    %44 = math.log %43 : vector<32x128xf32>
    %45 = arith.select %38, %36, %44 : vector<32x128xi1>, vector<32x128xf32>
    %cst_27 = arith.constant 9.99999997E-7 : f32
    %46 = vector.broadcast %cst_27 : f32 to vector<32x128xf32>
    %47 = arith.addf %46, %45 : vector<32x128xf32>
    %c0_28 = arith.constant 0 : index
    %c0_29 = arith.constant 0 : index
    %48 = vector.load %arg3[%c0_28, %c0_29] : memref<32x128xf32, #tpu.memory_space<vmem>>, vector<32x128xf32>
    %49 = arith.mulf %47, %48 : vector<32x128xf32>
    %50 = arith.addf %35, %49 : vector<32x128xf32>
    %51 = arith.truncf %50 : vector<32x128xf32> to vector<32x128xbf16>
    %c0_30 = arith.constant 0 : index
    %c0_31 = arith.constant 0 : index
    %52 = vector.load %arg10[%c0_30, %c0_31] : memref<128x128xbf16, #tpu.memory_space<vmem>>, vector<128x128xbf16>
    %cst_32 = arith.constant dense<0.000000e+00> : vector<32x128xf32>
    %53 = tpu.matmul %51, %52, %cst_32 {dimension_numbers = #tpu.dot_dimension_numbers<[1], [0], [0], [1], [0, 0, 1, 1], [], []>} : vector<32x128xbf16>, vector<128x128xbf16>, vector<32x128xf32> -> vector<32x128xf32>
    %c0_33 = arith.constant 0 : index
    %c0_34 = arith.constant 0 : index
    %54 = vector.load %arg11[%c0_33, %c0_34] : memref<1x128xf32, #tpu.memory_space<vmem>>, vector<1x128xf32>
    %55 = vector.broadcast %54 : vector<1x128xf32> to vector<32x128xf32>
    %56 = arith.addf %53, %55 : vector<32x128xf32>
    %57 = math.tanh %56 : vector<32x128xf32>
    %58 = arith.truncf %57 : vector<32x128xf32> to vector<32x128xbf16>
    %c0_35 = arith.constant 0 : index
    %c0_36 = arith.constant 0 : index
    %59 = vector.load %arg12[%c0_35, %c0_36] : memref<128x128xbf16, #tpu.memory_space<vmem>>, vector<128x128xbf16>
    %cst_37 = arith.constant dense<0.000000e+00> : vector<32x128xf32>
    %60 = tpu.matmul %58, %59, %cst_37 {dimension_numbers = #tpu.dot_dimension_numbers<[1], [0], [0], [1], [0, 0, 1, 1], [], []>} : vector<32x128xbf16>, vector<128x128xbf16>, vector<32x128xf32> -> vector<32x128xf32>
    %c0_38 = arith.constant 0 : index
    %c0_39 = arith.constant 0 : index
    %61 = vector.load %arg13[%c0_38, %c0_39] : memref<1x128xf32, #tpu.memory_space<vmem>>, vector<1x128xf32>
    %62 = vector.broadcast %61 : vector<1x128xf32> to vector<32x128xf32>
    %63 = arith.addf %60, %62 : vector<32x128xf32>
    %cst_40 = arith.constant 0.000000e+00 : f32
    %64 = vector.broadcast %cst_40 : f32 to vector<32x128xf32>
    %65 = arith.cmpf ogt, %63, %64 : vector<32x128xf32>
    %cst_41 = arith.constant 0.000000e+00 : f32
    %66 = vector.broadcast %cst_41 : f32 to vector<32x128xf32>
    %67 = arith.minimumf %63, %66 : vector<32x128xf32>
    %68 = math.exp %67 : vector<32x128xf32>
    %cst_42 = arith.constant 1.000000e+00 : f32
    %69 = vector.broadcast %cst_42 : f32 to vector<32x128xf32>
    %70 = arith.subf %68, %69 : vector<32x128xf32>
    %71 = arith.select %65, %63, %70 : vector<32x128xi1>, vector<32x128xf32>
    %72 = arith.truncf %71 : vector<32x128xf32> to vector<32x128xbf16>
    %c0_43 = arith.constant 0 : index
    %c0_44 = arith.constant 0 : index
    %73 = vector.load %arg14[%c0_43, %c0_44] : memref<128x784xbf16, #tpu.memory_space<vmem>>, vector<128x784xbf16>
    %cst_45 = arith.constant dense<0.000000e+00> : vector<32x784xf32>
    %74 = tpu.matmul %72, %73, %cst_45 {dimension_numbers = #tpu.dot_dimension_numbers<[1], [0], [0], [1], [0, 0, 1, 1], [], []>} : vector<32x128xbf16>, vector<128x784xbf16>, vector<32x784xf32> -> vector<32x784xf32>
    %c0_46 = arith.constant 0 : index
    %c0_47 = arith.constant 0 : index
    %75 = vector.load %arg15[%c0_46, %c0_47] : memref<1x784xf32, #tpu.memory_space<vmem>>, vector<1x784xf32>
    %76 = vector.broadcast %75 : vector<1x784xf32> to vector<32x784xf32>
    %77 = arith.addf %74, %76 : vector<32x784xf32>
    %cst_48 = arith.constant 0.000000e+00 : f32
    %78 = vector.broadcast %cst_48 : f32 to vector<32x784xf32>
    %79 = arith.subf %78, %77 : vector<32x784xf32>
    %cst_49 = arith.constant 2.000000e+01 : f32
    %80 = vector.broadcast %cst_49 : f32 to vector<32x784xf32>
    %81 = arith.minimumf %79, %80 : vector<32x784xf32>
    %82 = math.exp %81 : vector<32x784xf32>
    %cst_50 = arith.constant 2.000000e+01 : f32
    %83 = vector.broadcast %cst_50 : f32 to vector<32x784xf32>
    %84 = arith.cmpf ogt, %79, %83 : vector<32x784xf32>
    %cst_51 = arith.constant 1.000000e+00 : f32
    %85 = vector.broadcast %cst_51 : f32 to vector<32x784xf32>
    %86 = arith.addf %85, %82 : vector<32x784xf32>
    %87 = math.log %86 : vector<32x784xf32>
    %88 = arith.select %84, %79, %87 : vector<32x784xi1>, vector<32x784xf32>
    %cst_52 = arith.constant 1.000000e+00 : f32
    %89 = vector.broadcast %cst_52 : f32 to vector<32x784xf32>
    %90 = arith.addf %89, %82 : vector<32x784xf32>
    %91 = tpu.reciprocal %90 {approx = true} : vector<32x784xf32> -> vector<32x784xf32>
    %92 = arith.truncf %91 : vector<32x784xf32> to vector<32x784xbf16>
    %c0_53 = arith.constant 0 : index
    %c0_54 = arith.constant 0 : index
    %93 = vector.load %arg17[%c0_53, %c0_54] : memref<32x784xbf16, #tpu.memory_space<vmem>>, vector<32x784xbf16>
    tpu.vector_store %arg17[%c0_53, %c0_54], %92 {strides = array<i32>} : memref<32x784xbf16, #tpu.memory_space<vmem>>, vector<32x784xbf16>,
    %cst_55 = arith.constant 0.000000e+00 : f32
    %94 = vector.broadcast %cst_55 : f32 to vector<32x784xf32>
    %95 = arith.subf %94, %88 : vector<32x784xf32>
    %cst_56 = arith.constant 1.000000e+00 : f32
    %96 = vector.broadcast %cst_56 : f32 to vector<32x784xf32>
    %97 = arith.subf %96, %6 : vector<32x784xf32>
    %98 = arith.mulf %97, %77 : vector<32x784xf32>
    %99 = arith.subf %95, %98 : vector<32x784xf32>
    %cst_57 = arith.constant dense<0.000000e+00> : vector<32xf32>
    %100 = vector.multi_reduction <add>, %99, %cst_57 [1] : vector<32x784xf32> to vector<32xf32>
    %101 = vector.shape_cast %100 : vector<32xf32> to vector<32x1xf32>
    %c0_58 = arith.constant 0 : index
    %c0_59 = arith.constant 0 : index
    %102 = vector.load %arg18[%c0_58, %c0_59] : memref<32x1xf32, #tpu.memory_space<vmem>>, vector<32x1xf32>
    tpu.vector_store %arg18[%c0_58, %c0_59], %101 {strides = array<i32>} : memref<32x1xf32, #tpu.memory_space<vmem>>, vector<32x1xf32>,
    %103 = tpu.iota {dimensions = array<i32: 1>} : vector<32x128xi32>
    %104 = arith.mulf %47, %47 : vector<32x128xf32>
    %c2_i32 = arith.constant 2 : i32
    %105 = vector.broadcast %c2_i32 : i32 to vector<32x128xi32>
    %106 = arith.cmpi slt, %103, %105 : vector<32x128xi32>
    %107 = arith.mulf %35, %35 : vector<32x128xf32>
    %108 = arith.addf %107, %104 : vector<32x128xf32>
    %cst_60 = arith.constant 1.000000e-07 : f32
    %109 = vector.broadcast %cst_60 : f32 to vector<32x128xf32>
    %110 = arith.addf %109, %104 : vector<32x128xf32>
    %111 = math.log %110 : vector<32x128xf32>
    %112 = arith.subf %108, %111 : vector<32x128xf32>
    %cst_61 = arith.constant 1.000000e+00 : f32
    %113 = vector.broadcast %cst_61 : f32 to vector<32x128xf32>
    %114 = arith.subf %112, %113 : vector<32x128xf32>
    %cst_62 = arith.constant 0.000000e+00 : f32
    %115 = vector.broadcast %cst_62 : f32 to vector<32x128xf32>
    %116 = arith.select %106, %114, %115 : vector<32x128xi1>, vector<32x128xf32>
    %cst_63 = arith.constant dense<0.000000e+00> : vector<32xf32>
    %117 = vector.multi_reduction <add>, %116, %cst_63 [1] : vector<32x128xf32> to vector<32xf32>
    %118 = vector.shape_cast %117 : vector<32xf32> to vector<32x1xf32>
    %cst_64 = arith.constant 5.000000e-01 : f32
    %119 = vector.broadcast %cst_64 : f32 to vector<32x1xf32>
    %120 = arith.mulf %119, %118 : vector<32x1xf32>
    %c0_65 = arith.constant 0 : index
    %c0_66 = arith.constant 0 : index
    %121 = vector.load %arg19[%c0_65, %c0_66] : memref<32x1xf32, #tpu.memory_space<vmem>>, vector<32x1xf32>
    tpu.vector_store %arg19[%c0_65, %c0_66], %120 {strides = array<i32>} : memref<32x1xf32, #tpu.memory_space<vmem>>, vector<32x1xf32>,
    return
  }
  func.func @transform_0(%arg0: i32) -> (i32, i32) {
    %c0_i32 = arith.constant 0 : i32
    %c0_i32_0 = arith.constant 0 : i32
    return %arg0, %c0_i32 : i32, i32
  }
  func.func @transform_1(%arg0: i32) -> (i32, i32) {
    %c0_i32 = arith.constant 0 : i32
    %c0_i32_0 = arith.constant 0 : i32
    return %arg0, %c0_i32 : i32, i32
  }
  func.func @transform_2(%arg0: i32) -> (i32, i32) {
    %c0_i32 = arith.constant 0 : i32
    %c0_i32_0 = arith.constant 0 : i32
    return %arg0, %c0_i32 : i32, i32
  }
  func.func @transform_3(%arg0: i32) -> (i32, i32) {
    %c0_i32 = arith.constant 0 : i32
    %c0_i32_0 = arith.constant 0 : i32
    %c0_i32_1 = arith.constant 0 : i32
    return %c0_i32, %c0_i32_0 : i32, i32
  }
  func.func @transform_4(%arg0: i32) -> (i32, i32) {
    %c0_i32 = arith.constant 0 : i32
    %c0_i32_0 = arith.constant 0 : i32
    %c0_i32_1 = arith.constant 0 : i32
    return %c0_i32, %c0_i32_0 : i32, i32
  }
  func.func @transform_5(%arg0: i32) -> (i32, i32) {
    %c0_i32 = arith.constant 0 : i32
    %c0_i32_0 = arith.constant 0 : i32
    %c0_i32_1 = arith.constant 0 : i32
    return %c0_i32, %c0_i32_0 : i32, i32
  }
  func.func @transform_6(%arg0: i32) -> (i32, i32) {
    %c0_i32 = arith.constant 0 : i32
    %c0_i32_0 = arith.constant 0 : i32
    %c0_i32_1 = arith.constant 0 : i32
    return %c0_i32, %c0_i32_0 : i32, i32
  }
  func.func @transform_7(%arg0: i32) -> (i32, i32) {
    %c0_i32 = arith.constant 0 : i32
    %c0_i32_0 = arith.constant 0 : i32
    %c0_i32_1 = arith.constant 0 : i32
    return %c0_i32, %c0_i32_0 : i32, i32
  }
  func.func @transform_8(%arg0: i32) -> (i32, i32) {
    %c0_i32 = arith.constant 0 : i32
    %c0_i32_0 = arith.constant 0 : i32
    %c0_i32_1 = arith.constant 0 : i32
    return %c0_i32, %c0_i32_0 : i32, i32
  }
  func.func @transform_9(%arg0: i32) -> (i32, i32) {
    %c0_i32 = arith.constant 0 : i32
    %c0_i32_0 = arith.constant 0 : i32
    %c0_i32_1 = arith.constant 0 : i32
    return %c0_i32, %c0_i32_0 : i32, i32
  }
  func.func @transform_10(%arg0: i32) -> (i32, i32) {
    %c0_i32 = arith.constant 0 : i32
    %c0_i32_0 = arith.constant 0 : i32
    %c0_i32_1 = arith.constant 0 : i32
    return %c0_i32, %c0_i32_0 : i32, i32
  }
  func.func @transform_11(%arg0: i32) -> (i32, i32) {
    %c0_i32 = arith.constant 0 : i32
    %c0_i32_0 = arith.constant 0 : i32
    %c0_i32_1 = arith.constant 0 : i32
    return %c0_i32, %c0_i32_0 : i32, i32
  }
  func.func @transform_12(%arg0: i32) -> (i32, i32) {
    %c0_i32 = arith.constant 0 : i32
    %c0_i32_0 = arith.constant 0 : i32
    %c0_i32_1 = arith.constant 0 : i32
    return %c0_i32, %c0_i32_0 : i32, i32
  }
  func.func @transform_13(%arg0: i32) -> (i32, i32) {
    %c0_i32 = arith.constant 0 : i32
    %c0_i32_0 = arith.constant 0 : i32
    %c0_i32_1 = arith.constant 0 : i32
    return %c0_i32, %c0_i32_0 : i32, i32
  }
  func.func @transform_14(%arg0: i32) -> (i32, i32) {
    %c0_i32 = arith.constant 0 : i32
    %c0_i32_0 = arith.constant 0 : i32
    %c0_i32_1 = arith.constant 0 : i32
    return %c0_i32, %c0_i32_0 : i32, i32
  }
  func.func @transform_15(%arg0: i32) -> (i32, i32) {
    %c0_i32 = arith.constant 0 : i32
    %c0_i32_0 = arith.constant 0 : i32
    return %arg0, %c0_i32 : i32, i32
  }
  func.func @transform_16(%arg0: i32) -> (i32, i32) {
    %c0_i32 = arith.constant 0 : i32
    %c0_i32_0 = arith.constant 0 : i32
    return %arg0, %c0_i32 : i32, i32
  }
  func.func @transform_17(%arg0: i32) -> (i32, i32) {
    %c0_i32 = arith.constant 0 : i32
    %c0_i32_0 = arith.constant 0 : i32
    return %arg0, %c0_i32 : i32, i32
  }
  func.func @transform_18(%arg0: i32) -> (i32, i32) {
    %c0_i32 = arith.constant 0 : i32
    %c0_i32_0 = arith.constant 0 : i32
    return %arg0, %c0_i32 : i32, i32
  }
}

</mosaic_0001>

<bundles_post_ra>
// kernel: vae_forward.1
= control target key start
LH: loop header
LB: loop body
LE: loop exit
PB: predicated region body
PF: predicated region fallthrough
CT: control target
= control target key end

     0   :  { %s6074_s0 = inlined_call_operand.vmem [shape: f32[64,784], index: 0, kind: input, shape index: {}]   ;;  %s6075_s1 = inlined_call_operand.vmem [shape: f32[64,784], index: 1, kind: input, shape index: {}]   ;;  %s6076_s2 = inlined_call_operand.vmem [shape: f32[64,128], index: 2, kind: input, shape index: {}]   ;;  %s6077_s3 = inlined_call_operand.hbm [shape: bf16[784,128], index: 3, kind: input, shape index: {}]   ;;  %s6078_s4 = inlined_call_operand.vmem [shape: f32[1,128], index: 4, kind: input, shape index: {}]   ;;  %s6079_s5 = inlined_call_operand.hbm [shape: bf16[128,128], index: 5, kind: input, shape index: {}]   ;;  %s6080_s6 = inlined_call_operand.vmem [shape: f32[1,128], index: 6, kind: input, shape index: {}]   ;;  %s6081_s7 = inlined_call_operand.vmem [shape: bf16[128,256], index: 7, kind: input, shape index: {}]   ;;  %s6082_s8 = inlined_call_operand.vmem [shape: f32[1,256], index: 8, kind: input, shape index: {}]   ;;  %s6083_s9 = inlined_call_operand.hbm [shape: bf16[128,128], index: 9, kind: input, shape index: {}]   ;;  %s6084_s10 = inlined_call_operand.vmem [shape: f32[1,128], index: 10, kind: input, shape index: {}]   ;;  %s6085_s11 = inlined_call_operand.hbm [shape: bf16[128,128], index: 11, kind: input, shape index: {}]   ;;  %s6086_s12 = inlined_call_operand.vmem [shape: f32[1,128], index: 12, kind: input, shape index: {}]   ;;  %s6087_s13 = inlined_call_operand.vmem [shape: bf16[128,784], index: 13, kind: input, shape index: {}]   ;;  %s6088_s14 = inlined_call_operand.vmem [shape: f32[1,784], index: 14, kind: input, shape index: {}]   ;;  %s6089_s15 = inlined_call_operand.hbm [shape: f32[64,784], index: 15, kind: output, shape index: {0}]   ;;  %s6090_s16 = inlined_call_operand.hbm [shape: bf16[64,784], index: 16, kind: output, shape index: {1}]   ;;  %s6091_s17 = inlined_call_operand.vmem [shape: f32[64,1], index: 17, kind: output, shape index: {2}]   ;;  %s6092_s18 = inlined_call_operand.vmem [shape: f32[64,1], index: 18, kind: output, shape index: {3}]  }
   0x1   :  { %6118 = sst [smem:[#allocation36_spill]] %s6074_s0 }
   0x2   :  { %6119 = sst [smem:[#allocation37_spill]] %s6075_s1 }
   0x3   :  { %6120 = sst [smem:[#allocation38_spill]] %s6076_s2 }
   0x4   :  { %6121 = sst [smem:[#allocation39_spill]] %s6077_s3 }
   0x5   :  { %6122 = sst [smem:[#allocation40_spill]] %s6078_s4 }
   0x6   :  { %6123 = sst [smem:[#allocation41_spill]] %s6079_s5 }
   0x7   :  { %6124 = sst [smem:[#allocation42_spill]] %s6080_s6 }
   0x8   :  { %24 = vsyncpa [#allocation3], 0 }
   0x9   :  { %25 = vsyncpa [#allocation6], 0 }
   0xa   :  { %26 = vsyncpa [#allocation9], 0 }
   0xb   :  { %27 = vsyncpa [#allocation4], 0 }
   0xc   :  { %29 = vsyncpa [#allocation4 + $0x1], 0 }
   0xd   :  { %30 = vsyncpa [#allocation12], 0 }
   0xe   :  { %32 = vsyncpa [#allocation12 + $0x1], 0  ;;  %s4874_s27 = smov 0   ;;  %s4876_s28 = smov 0  }
   0xf   :  { %s4878_s29 = smov 0   ;;  %s4880_s30 = smov 0  }
  0x10 LB: > { %6125 = sst [smem:[#allocation18_spill]] %s4752_s27  ;;  %s4895_s0 = sadd.s32 4294967295, %s4764_s30   ;;  %s4764_s30 = sphi %s4880_s30, %s6187_s30   ;;  %s4760_s29 = sphi %s4878_s29, %s6189_s29   ;;  %s4756_s28 = sphi %s4876_s28, %s6191_s28   ;;  %s4752_s27 = sphi %s4874_s27, %s6190_s27  }
  0x11   : > { %6126 = sst [smem:[#allocation19_spill]] %s4760_s29  ;;  %s3598_s19 = sadd.s32 4294967294, %s4764_s30  }
  0x12   : > { %6127 = sst [smem:[#allocation20_spill]] %s4764_s30  ;;  %s4899_s1 = sadd.s32 1, %s4764_s30  }
  0x13   : > { %6128 = sst [smem:[#allocation21_spill]] %s4899_s1  ;;  %s375_s20 = sadd.s32 1, %s4760_s29 }
  0x14   : > { %s372_s21 = ssub.s32 %s4764_s30, %s4899_s1  ;;  %p385_p0 = scmp.ne.s32.totalorder %s4760_s29, %s4756_s28 }
  0x15   : > { %p373_p1 = scmp.eq.s32.totalorder %s372_s21, 0  ;;  %p386_p2 = scmp.eq.s32.totalorder %s4895_s0, 1 }
  0x16   : > { %p391_p3 = scmp.ne.s32.totalorder %s4756_s28, %s4752_s27  ;;  %p392_p4 = scmp.eq.s32.totalorder %s3598_s19, 1 }
  0x17   : > { %s4910_s22 = scalar_select %p373_p1, %s4760_s29, %s375_s20  }
  0x18   : > { %p4912_p5 = por %p386_p2, %p385_p0  ;;  %p4916_p6 = por %p392_p4, %p391_p3 }
  0x19   : > { %6129 = sst [smem:[#allocation22_spill]] %s4910_s22  ;;  %p3599_p7 = scmp.ge.s32.totalorder %s4764_s30, 1 }
  0x1a   : > { %s6131_s23 = scalar_select %p4916_p6, 1, 0 }
  0x1b   : > { %p477_p8 = scmp.lt.s32.totalorder %s4764_s30, 3  ;;  %p4081_p9 = scmp.eq.s32.totalorder %s4895_s0, 0 }
  0x1c   : > { %6132 = sst [smem:[#allocation23_spill]] %s6131_s23  ;;  %s4766_s25 = smov [#allocation5]  }
  0x1d   : > { %p4923_p10 = pnand %p3599_p7, %p477_p8  ;;  %s505_s26 = sshll.u32 %s4766_s25, 4  ;;  %s506_s26 = int_to_ptr.vmem [resolvable:$true] %s505_s26 }
  0x1e   : > { %s4767_s20 = smov [#allocation2]   ;;  %s4768_s22 = smov [#allocation7]  }
  0x1f   : > { %p4061_p11 = pneg %p4923_p10  ;;  %s489_s21 = sshll.u32 %s4767_s20, 4  ;;  %s490_s21 = int_to_ptr.vmem [resolvable:$true] %s489_s21 }
  0x20   : > { %s527_s29 = sshll.u32 %s4768_s22, 4  ;;  %s4569_s1 = scalar_lea.vmem %s506_s26, 1024  ;;  %s528_s29 = int_to_ptr.vmem [resolvable:$true] %s527_s29 }
  0x21   : > { %p4931_p12 = pnand %p4081_p9, %p4061_p11  ;;  %p4570_p0 = scmp.ne.s32.totalorder %s506_s26, %s4569_s1 }
  0x22   : > { %p4577_p3 = scmp.lt.s32.totalorder %s506_s26, %s506_s26  ;;  %p4578_p4 = scmp.lt.s32.totalorder %s4569_s1, %s4569_s1 }
  0x23   : > { %p4560_p13 = pneg %p4931_p12 }
  0x24   : > { %p4579_p7 = por %p4578_p4, %p4577_p3 }
  0x25   : > { %p4572_p1 = pnand %p4570_p0, %p4560_p13 }
  0x27   : > { %p4573_p2 = pneg %p4572_p1 }
  0x29   : > { %p4580_p8 = pnand %p4579_p7, %p4573_p2 }
  0x2b   : > { %4583 = shalt.err (!%p4580_p8)
}
  0x2c   : > { %s4769_s25 = smov 64   ;;  %s4770_s20 = smov 4  }
  0x2d   : > { %s6135_s5 = sld [smem:[#allocation41_spill]]  ;;  %s4595_s27 = scalar_lea.vmem %s490_s21, 6272 }
  0x2e   : > { %p4596_p11 = scmp.ne.s32.totalorder %s490_s21, %s4595_s27  ;;  %p4603_p2 = scmp.lt.s32.totalorder %s490_s21, %s490_s21 }
  0x2f   : > { %p4604_p3 = scmp.lt.s32.totalorder %s4595_s27, %s4595_s27 }
  0x30   : > { %p4598_p0 = pnand %p4596_p11, %p4560_p13 }
  0x31   : > { %p4605_p4 = por %p4604_p3, %p4603_p2 }
  0x32   : > { %p4599_p1 = pneg %p4598_p0 }
  0x33   : > { %4067 = dma.hbm_to_vmem [thread:$0]  (!%p4931_p12), %s6135_s5, 1024, %s506_s26, [#allocation6], %s4769_s25, %s4769_s25, %s4770_s20  }
  0x34   : > { %p4606_p7 = pnand %p4605_p4, %p4599_p1 }
  0x36   : > { %4609 = shalt.err (!%p4606_p7)
}
  0x37   : > { %s6136_s3 = sld [smem:[#allocation39_spill]]  ;;  %s4621_s23 = scalar_lea.vmem %s528_s29, 1024 }
  0x38   : > { %p4622_p8 = scmp.ne.s32.totalorder %s528_s29, %s4621_s23  ;;  %p4629_p2 = scmp.lt.s32.totalorder %s528_s29, %s528_s29 }
  0x39   : > { %p4630_p1 = scmp.lt.s32.totalorder %s4621_s23, %s4621_s23 }
  0x3a   : > { %p4624_p11 = pnand %p4622_p8, %p4560_p13 }
  0x3b   : > { %p4631_p3 = por %p4630_p1, %p4629_p2 }
  0x3c   : > { %p4625_p0 = pneg %p4624_p11 }
  0x3d   : > { %4064 = dma.hbm_to_vmem [thread:$0]  (!%p4931_p12), %s6136_s3, 6272, %s490_s21, [#allocation3], %s4769_s25, %s4769_s25, %s4770_s20  }
  0x3e   : > { %p4632_p4 = pnand %p4631_p3, %p4625_p0 }
  0x40   : > { %4635 = shalt.err (!%p4632_p4)
}
  0x41   : > { %4070 = dma.hbm_to_vmem [thread:$0]  (!%p4931_p12), %s6083_s9, 1024, %s528_s29, [#allocation6], %s4769_s25, %s4769_s25, %s4770_s20  }
  0x42   : > { %s4771_s26 = smov [#allocation8]  }
  0x43   : > { %s543_s21 = sshll.u32 %s4771_s26, 4  ;;  %s544_s21 = int_to_ptr.vmem [resolvable:$true] %s543_s21 }
  0x44   : > { %s4647_s22 = scalar_lea.vmem %s544_s21, 1024  ;;  %p4655_p0 = scmp.lt.s32.totalorder %s544_s21, %s544_s21 }
  0x45   : > { %p4648_p7 = scmp.ne.s32.totalorder %s544_s21, %s4647_s22  ;;  %p4656_p2 = scmp.lt.s32.totalorder %s4647_s22, %s4647_s22 }
  0x47   : > { %p4650_p8 = pnand %p4648_p7, %p4560_p13  ;;  %p4657_p1 = por %p4656_p2, %p4655_p0 }
  0x49   : > { %p4651_p11 = pneg %p4650_p8 }
  0x4b   : > { %p4658_p3 = pnand %p4657_p1, %p4651_p11 }
  0x4d   : > { %4661 = shalt.err (!%p4658_p3)
}
  0x4e   : > { %4073 = dma.hbm_to_vmem [thread:$0]  (!%p4931_p12), %s6085_s11, 1024, %s544_s21, [#allocation9], %s4769_s25, %s4769_s25, %s4770_s20  }
  0x4f   : > { %597 = sbr.rel (%p4923_p10) target bundleno = 1772 (0x6ec), region = 80 }
  0x54   : > { %4731 = dma.done.wait (%p4081_p9), [#allocation3], 6272  }
  0x55   : > { %4733 = vsyncadd (%p4081_p9), [#allocation3], 4294961024 }
  0x56   : > { %4735 = dma.done.wait (%p4081_p9), [#allocation6], 2048  }
  0x57   : > { %4737 = vsyncadd (%p4081_p9), [#allocation6], 4294965248 }
  0x58   : > { %4739 = dma.done.wait (%p4081_p9), [#allocation9], 1024  }
  0x59   : > { %4741 = vsyncadd (%p4081_p9), [#allocation9], 4294966272  ;;  %v4133_v0 = vld [vmem:[#allocation2 + $0x78] sm:$0xff]   ;;  %v4137_v4 = vld [vmem:[#allocation2 + $0x70] sm:$0xff]   ;;  %s3610_s24 = sshll.u32 %s4895_s0, 2  ;;  %s6137_s23 = sld [smem:[#allocation36_spill]] }
  0x5a   : > { %v4134_v1 = vld [vmem:[#allocation2 + $0x38] sm:$0xff]   ;;  %3823 = vmatprep.subr.bf16.mxu0 %v4133_v0  ;;  %v4138_v5 = vld [vmem:[#allocation2 + $0x30] sm:$0xff]   ;;  %v4141_v8 = vld [vmem:[#allocation2 + $0x68] sm:$0xff]   ;;  %p691_p9 = scmp.lt.s32.totalorder %s3610_s24, 7  ;;  %s6138_s21 = sld [smem:[#allocation37_spill]]  ;;  %vm871_vm0 = vcmask 130048  }
  0x5b   : > { %v4135_v2 = vld [vmem:[#allocation2 + $0xf8] sm:$0xff]   ;;  %3824 = vmatpush3.bf16.msra.mxu0 %v4134_v1  ;;  %v4139_v6 = vld [vmem:[#allocation2 + $0xf0] sm:$0xff]   ;;  %v4142_v9 = vld [vmem:[#allocation2 + $0x28] sm:$0xff]   ;;  %s5010_s29 = sand.u32 1, %s4756_s28   ;;  %s6141_s4 = sld [smem:[#allocation40_spill]]  ;;  %vm3274_vm10 = vcmask 7168  }
  0x5c   : > { %v4136_v3 = vld [vmem:[#allocation2 + $0xb8] sm:$0xff]   ;;  %3851 = vmatprep.subr.bf16.mxu1 %v4135_v2  ;;  %3825 = vmatprep.subr.bf16.mxu0 %v4137_v4  ;;  %v4140_v7 = vld [vmem:[#allocation2 + $0xb0] sm:$0xff]   ;;  %v4143_v10 = vld [vmem:[#allocation2 + $0xe8] sm:$0xff]   ;;  %s6193_s24 = smov (!%p691_p9, %s3610_s24), 7  ;;  %s4036_s1 = smul.u32 224, %s5010_s29 }
  0x5d   : > { %3852 = vmatpush3.bf16.msra.mxu1 %v4136_v3  ;;  %v4144_v11 = vld [vmem:[#allocation2 + $0xa8] sm:$0xff]   ;;  %v4145_v12 = vld [vmem:[#allocation2 + $0x60] sm:$0xff]   ;;  %v4149_v16 = vld [vmem:[#allocation2 + $0x58] sm:$0xff]   ;;  %s4038_s19 = smul.u32 56, %s6193_s24  ;;  %s6142_s6 = sld [smem:[#allocation42_spill]] }
  0x5e   : > { %3853 = vmatprep.subr.bf16.mxu1 %v4139_v6  ;;  %v4146_v13 = vld [vmem:[#allocation2 + $0x20] sm:$0xff]   ;;  %v4150_v17 = vld [vmem:[#allocation2 + $0x18] sm:$0xff]   ;;  %v4153_v20 = vld [vmem:[#allocation2 + $0x50] sm:$0xff]   ;;  %s6143_s20 = sld [smem:[#allocation38_spill]]  ;;  %s4039_s26 = smul.u32 3584, %s4895_s0 }
  0x5f   : > { %3826 = vmatpush3.bf16.msra.mxu0 %v4138_v5  ;;  %v4147_v14 = vld [vmem:[#allocation2 + $0xe0] sm:$0xff]   ;;  %v4151_v18 = vld [vmem:[#allocation2 + $0xd8] sm:$0xff]   ;;  %v4154_v21 = vld [vmem:[#allocation2 + $0x10] sm:$0xff]   ;;  %s5002_s27 = scalar_lea.vmem %s6137_s23, %s4038_s19 }
  0x60   : > { %3827 = vmatprep.subr.bf16.mxu0 %v4141_v8  ;;  %v4148_v15 = vld [vmem:[#allocation2 + $0xa0] sm:$0xff]   ;;  %v4152_v19 = vld [vmem:[#allocation2 + $0x98] sm:$0xff]   ;;  %v4155_v22 = vld [vmem:[#allocation2 + $0xd0] sm:$0xff]   ;;  %s5007_s22 = scalar_lea.vmem %s6138_s21, %s4038_s19  ;;  %s5027_s19 = scalar_lea.vmem [#allocation10], %s4036_s1 }
  0x61   : > { %3854 = vmatpush3.bf16.msra.mxu1 %v4140_v7  ;;  %v4156_v23 = vld [vmem:[#allocation2 + $0x90] sm:$0xff]   ;;  %v4157_v24 = vld [vmem:[#allocation2 + $0x48] sm:$0xff]   ;;  %v4161_v28 = vld [vmem:[#allocation2 + $0x40] sm:$0xff]   ;;  %s5193_s1 = sshll.u32 %s6193_s24, 3  ;;  %s3364_s21 = sshll.u32 %s5027_s19, 4  ;;  %s5991_s21 = int_to_ptr.vmem [resolvable:$true] %s3364_s21 }
  0x62   : > { %3855 = vmatprep.subr.bf16.mxu1 %v4143_v10  ;;  %v4158_v25 = vld [vmem:[#allocation2 + $0x8] sm:$0xff]   ;;  %v4162_v29 = vld [vmem:[#allocation2] sm:$0xff]   ;;  %v732_v39 = vld [vmem:[%s5002_s27 + $0x38] sm:$0xff]  ;;  %s4662_s24 = scalar_lea.vmem %s5991_s21, 3584 }
  0x63   : > { %3828 = vmatpush3.bf16.msra.mxu0 %v4142_v9  ;;  %v4159_v26 = vld [vmem:[#allocation2 + $0xc8] sm:$0xff]   ;;  %v4163_v30 = vld [vmem:[#allocation2 + $0xc0] sm:$0xff]   ;;  %v760_v43 = vadd.f32 1.0, %v732_v39  ;;  %v816_v45 = vld [vmem:[%s5007_s22 + $0x38] sm:$0xff]  ;;  %p4663_p10 = scmp.ne.s32.totalorder %s5991_s21, %s4662_s24 }
  0x64   : > { %3829 = vmatprep.subr.bf16.mxu0 %v4145_v12  ;;  %v4160_v27 = vld [vmem:[#allocation2 + $0x88] sm:$0xff]   ;;  %v733_v32 = vld [vmem:[%s5002_s27 + $0x40] sm:$0xff]  ;;  %v4165_v46 = vld [vmem:[#allocation2 + $0x178] sm:$0xff]   ;;  %s5200_s23 = scalar_lea.vmem %s6143_s20, %s5193_s1  ;;  %s722_s20 = scalar_lea.vmem %s6092_s18, %s5193_s1 }
  0x65   : > { %3856 = vmatpush3.bf16.msra.mxu1 %v4144_v11  ;;  %v726_v31 = vld [vmem:[%s5002_s27 + $0x8] sm:$0xff]  ;;  %v761_v35 = vadd.f32 1.0, %v733_v32  ;;  %v817_v36 = vld [vmem:[%s5007_s22 + $0x40] sm:$0xff]  ;;  %v788_v50 = vmul.f32 0.5, %v760_v43  ;;  %v728_v51 = vld [vmem:[%s5002_s27 + $0x18] sm:$0xff]  ;;  %p4664_p12 = pnand %p4663_p10, %p4912_p5 }
  0x66   : > { %3857 = vmatprep.subr.bf16.mxu1 %v4147_v14  ;;  %v810_v33 = vld [vmem:[%s5007_s22 + $0x8] sm:$0xff]  ;;  %v754_v34 = vadd.f32 1.0, %v726_v31  ;;  %v4164_v37 = vld [vmem:[#allocation2 + $0x80] sm:$0xff]   ;;  %v735_v52 = vld [vmem:[%s5002_s27 + $0x50] sm:$0xff]  ;;  %v756_v54 = vadd.f32 1.0, %v728_v51 }
  0x67   : > { %3830 = vmatpush3.bf16.msra.mxu0 %v4146_v13  ;;  %v725_v38 = vld [vmem:[%s5002_s27] sm:$0xff]  ;;  %v789_v41 = vmul.f32 0.5, %v761_v35  ;;  %v812_v53 = vld [vmem:[%s5007_s22 + $0x18] sm:$0xff]  ;;  %v763_v55 = vadd.f32 1.0, %v735_v52  ;;  %v819_v56 = vld [vmem:[%s5007_s22 + $0x50] sm:$0xff]  ;;  %v844_v60 = vadd.f32 %v816_v45, %v788_v50  ;;  %p4665_p13 = pneg %p4664_p12 }
  0x68   : > { %3831 = vmatprep.subr.bf16.mxu0 %v4149_v16  ;;  %v782_v40 = vmul.f32 0.5, %v754_v34  ;;  %v753_v42 = vadd.f32 1.0, %v725_v38  ;;  %v809_v44 = vld [vmem:[%s5007_s22] sm:$0xff]  ;;  %v4166_v57 = vld [vmem:[#allocation2 + $0x138] sm:$0xff]   ;;  %v727_v61 = vld [vmem:[%s5002_s27 + $0x10] sm:$0xff]  ;;  %v784_v63 = vmul.f32 0.5, %v756_v54 }
  0x69   : > { %3858 = vmatpush3.bf16.msra.mxu1 %v4148_v15  ;;  %v845_v48 = vadd.f32 %v817_v36, %v789_v41  ;;  %v734_v62 = vld [vmem:[%s5002_s27 + $0x48] sm:$0xff]  ;;  %v791_v0 = vmul.f32 0.5, %v763_v55  ;;  %v755_v1 = vadd.f32 1.0, %v727_v61  ;;  %v811_v3 = vld [vmem:[%s5007_s22 + $0x10] sm:$0xff]  ;;  %873 = vst [vmem:[%s5027_s19 + $0x38] sm:$0xff] %v844_v60  ;;  %v749_v36 = vld [vmem:[%s5002_s27 + $0xc0] sm:$0xff] }
  0x6a   : > { %3859 = vmatprep.subr.bf16.mxu1 %v4151_v18  ;;  %v838_v47 = vadd.f32 %v810_v33, %v782_v40  ;;  %v781_v49 = vmul.f32 0.5, %v753_v42  ;;  %v762_v2 = vadd.f32 1.0, %v734_v62  ;;  %v818_v4 = vld [vmem:[%s5007_s22 + $0x48] sm:$0xff]  ;;  %v4167_v6 = vld [vmem:[#allocation2 + $0x170] sm:$0xff]   ;;  %v840_v7 = vadd.f32 %v812_v53, %v784_v63  ;;  %v740_v18 = vld [vmem:[%s5002_s27 + $0x78] sm:$0xff] }
  0x6b   : > { %3832 = vmatpush3.bf16.msra.mxu0 %v4150_v17  ;;  %874 = vst [vmem:[%s5027_s19 + $0x40] sm:$0xff] %v845_v48  ;;  %v847_v8 = vadd.f32 %v819_v56, %v791_v0  ;;  %v783_v9 = vmul.f32 0.5, %v755_v1  ;;  %v4168_v14 = vld [vmem:[#allocation2 + $0x130] sm:$0xff]   ;;  %v4169_v15 = vld [vmem:[#allocation2 + $0x168] sm:$0xff]   ;;  %v741_v42 = vld [vmem:[%s5002_s27 + $0x80] sm:$0xff] }
  0x6c   : > { %3833 = vmatprep.subr.bf16.mxu0 %v4153_v20  ;;  %866 = vst [vmem:[%s5027_s19 + $0x8] sm:$0xff] %v838_v47  ;;  %v895_v58 = vpack.c.bf16 %v845_v48, %v838_v47  ;;  %v837_v59 = vadd.f32 %v809_v44, %v781_v49  ;;  %v790_v10 = vmul.f32 0.5, %v762_v2  ;;  %868 = vst [vmem:[%s5027_s19 + $0x18] sm:$0xff] %v840_v7  ;;  %v4170_v17 = vld [vmem:[#allocation2 + $0x128] sm:$0xff]   ;;  %v4171_v20 = vld [vmem:[#allocation2 + $0x160] sm:$0xff]   ;;  %v769_v48 = vadd.f32 1.0, %v741_v42 }
  0x6d   : > { %3860 = vmatpush3.bf16.msra.mxu1 %v4152_v19  ;;  %876 = vst [vmem:[%s5027_s19 + $0x50] sm:$0xff] %v847_v8  ;;  %v897_v11 = vpack.c.bf16 %v847_v8, %v840_v7  ;;  %v839_v12 = vadd.f32 %v811_v3, %v783_v9  ;;  %v747_v19 = vld [vmem:[%s5002_s27 + $0xb0] sm:$0xff]  ;;  %v830_v34 = vld [vmem:[%s5007_s22 + $0xa8] sm:$0xff]  ;;  %v748_v43 = vld [vmem:[%s5002_s27 + $0xb8] sm:$0xff] }
  0x6e   : > { %3861 = vmatprep.subr.bf16.mxu1 %v4155_v22  ;;  %1345 = vmatprep.mubr.bf16.mxu0 %v895_v58  ;;  %865 = vst [vmem:[%s5027_s19] sm:$0xff] %v837_v59  ;;  %v894_v5 = vpack.c.bf16 %v844_v60, %v837_v59  ;;  %v846_v13 = vadd.f32 %v818_v4, %v790_v10  ;;  %v775_v22 = vadd.f32 1.0, %v747_v19  ;;  %v823_v32 = vld [vmem:[%s5007_s22 + $0x70] sm:$0xff]  ;;  %v742_v35 = vld [vmem:[%s5002_s27 + $0x88] sm:$0xff]  ;;  %v4174_v44 = vld [vmem:[#allocation2 + $0x118] sm:$0xff]   ;;  %v776_v49 = vadd.f32 1.0, %v748_v43 }
  0x6f   : > { %3834 = vmatpush3.bf16.msra.mxu0 %v4154_v21  ;;  %1394 = vmatprep.mubr.bf16.mxu1 %v897_v11  ;;  %867 = vst [vmem:[%s5027_s19 + $0x10] sm:$0xff] %v839_v12  ;;  %v768_v21 = vadd.f32 1.0, %v740_v18  ;;  %v770_v40 = vadd.f32 1.0, %v742_v35  ;;  %v826_v41 = vld [vmem:[%s5007_s22 + $0x88] sm:$0xff]  ;;  %v833_v47 = vld [vmem:[%s5007_s22 + $0xc0] sm:$0xff]  ;;  %v832_v54 = vld [vmem:[%s5007_s22 + $0xb8] sm:$0xff] }
  0x70   : > { %3835 = vmatprep.subr.bf16.mxu0 %v4157_v24  ;;  %875 = vst [vmem:[%s5027_s19 + $0x48] sm:$0xff] %v846_v13  ;;  %v896_v16 = vpack.c.bf16 %v846_v13, %v839_v12  ;;  %v4172_v24 = vld [vmem:[#allocation2 + $0x120] sm:$0xff]   ;;  %v804_v58 = vmul.f32 0.5, %v776_v49  ;;  %v4175_v59 = vld [vmem:[#allocation2 + $0x150] sm:$0xff]   ;;  %v730_v7 = vld [vmem:[%s5002_s27 + $0x28] sm:$0xff] }
  0x71   : > { %3862 = vmatpush3.bf16.msra.mxu1 %v4156_v23  ;;  %v824_v23 = vld [vmem:[%s5007_s22 + $0x78] sm:$0xff]  ;;  %v825_v50 = vld [vmem:[%s5007_s22 + $0x80] sm:$0xff]  ;;  %v798_v53 = vmul.f32 0.5, %v770_v40  ;;  %v4176_v1 = vld [vmem:[#allocation2 + $0x110] sm:$0xff]   ;;  %v758_v10 = vadd.f32 1.0, %v730_v7 }
  0x72   : > { %3863 = vmatprep.subr.bf16.mxu1 %v4159_v26  ;;  %v739_v26 = vld [vmem:[%s5002_s27 + $0x70] sm:$0xff]  ;;  %v860_v0 = vadd.f32 %v832_v54, %v804_v58  ;;  %v4179_v4 = vld [vmem:[#allocation2 + $0x180] sm:$0xff]   ;;  %v814_v12 = vld [vmem:[%s5007_s22 + $0x28] sm:$0xff] }
  0x73   : > { %3836 = vmatpush3.bf16.msra.mxu0 %v4158_v25  ;;  %v831_v25 = vld [vmem:[%s5007_s22 + $0xb0] sm:$0xff]  ;;  %v767_v31 = vadd.f32 1.0, %v739_v26  ;;  %v854_v60 = vadd.f32 %v826_v41, %v798_v53  ;;  %v737_v8 = vld [vmem:[%s5002_s27 + $0x60] sm:$0xff]  ;;  %v786_v18 = vmul.f32 0.5, %v758_v10  ;;  %v836_v42 = vld [vmem:[%s5007_s22 + $0xd8] sm:$0xff] }
  0x74   : > { %3837 = vmatprep.subr.bf16.mxu0 %v4161_v28  ;;  %v796_v28 = vmul.f32 0.5, %v768_v21  ;;  %889 = vst [vmem:[%s5027_s19 + $0xb8] sm:$0xff] %v860_v0  ;;  %v4180_v9 = vld [vmem:[#allocation2 + $0x140] sm:$0xff]   ;;  %v765_v11 = vadd.f32 1.0, %v737_v8  ;;  %v820_v21 = vld [vmem:[%s5007_s22 + $0x58] sm:$0xff]  ;;  %v751_v43 = vld [vmem:[%s5002_s27 + $0xd0] sm:$0xff] }
  0x75   : > { %3864 = vmatpush3.bf16.msra.mxu1 %v4160_v27  ;;  %v4173_v27 = vld [vmem:[#allocation2 + $0x158] sm:$0xff]   ;;  %v795_v39 = vmul.f32 0.5, %v767_v31  ;;  %883 = vst [vmem:[%s5027_s19 + $0x88] sm:$0xff] %v854_v60  ;;  %v729_v13 = vld [vmem:[%s5002_s27 + $0x20] sm:$0xff]  ;;  %v842_v31 = vadd.f32 %v814_v12, %v786_v18  ;;  %v835_v49 = vld [vmem:[%s5007_s22 + $0xd0] sm:$0xff] }
  0x76   : > { %3865 = vmatprep.subr.bf16.mxu1 %v4163_v30  ;;  %v746_v30 = vld [vmem:[%s5002_s27 + $0xa8] sm:$0xff]  ;;  %v793_v19 = vmul.f32 0.5, %v765_v11  ;;  %v4182_v11 = vld [vmem:[#allocation5 + $0x38] sm:$0xff]   ;;  %v4183_v12 = vld [vmem:[#allocation5 + $0x30] sm:$0xff]  }
  0x77   : > { %3838 = vmatpush3.bf16.msra.mxu0 %v4162_v29  ;;  %v803_v29 = vmul.f32 0.5, %v775_v22  ;;  %v774_v33 = vadd.f32 1.0, %v746_v30  ;;  %v851_v52 = vadd.f32 %v823_v32, %v795_v39  ;;  %v731_v22 = vld [vmem:[%s5002_s27 + $0x30] sm:$0xff]  ;;  %v752_v30 = vld [vmem:[%s5002_s27 + $0xd8] sm:$0xff]  ;;  %870 = vst [vmem:[%s5027_s19 + $0x28] sm:$0xff] %v842_v31  ;;  %v4189_v18 = vld [vmem:[#allocation5] sm:$0xff]  }
  0x78   : > { %3879 = vmatprep.subr.bf16.mxu0 %v4165_v46  ;;  %v777_v46 = vadd.f32 1.0, %v749_v36  ;;  %v759_v26 = vadd.f32 1.0, %v731_v22  ;;  %v829_v36 = vld [vmem:[%s5007_s22 + $0xa0] sm:$0xff]  ;;  %v780_v41 = vadd.f32 1.0, %v752_v30 }
  0x79   : > { %3866 = vmatpush3.bf16.msra.mxu1 %v4164_v37  ;;  %v852_v37 = vadd.f32 %v824_v23, %v796_v28  ;;  %v859_v38 = vadd.f32 %v831_v25, %v803_v29  ;;  %v802_v45 = vmul.f32 0.5, %v774_v33  ;;  %880 = vst [vmem:[%s5027_s19 + $0x70] sm:$0xff] %v851_v52  ;;  %v738_v23 = vld [vmem:[%s5002_s27 + $0x68] sm:$0xff]  ;;  %v815_v28 = vld [vmem:[%s5007_s22 + $0x30] sm:$0xff]  ;;  %v745_v29 = vld [vmem:[%s5002_s27 + $0xa0] sm:$0xff] }
  0x7a   : > { %1346 = vmatmul.mubr.bf16.vlgmr.msra.gmra.mxu0 %v894_v5  ;;  %v805_v56 = vmul.f32 0.5, %v777_v46  ;;  %v4177_v5 = vld [vmem:[#allocation2 + $0x148] sm:$0xff]   ;;  %3950 = vmatprep.subr.bf16.mxu1 %v4179_v4  ;;  %v773_v35 = vadd.f32 1.0, %v745_v29  ;;  %v787_v39 = vmul.f32 0.5, %v759_v26  ;;  %v808_v54 = vmul.f32 0.5, %v780_v41 }
  0x7b   : > { %3880 = vmatpush3.bf16.msra.mxu0 %v4166_v57  ;;  %881 = vst [vmem:[%s5027_s19 + $0x78] sm:$0xff] %v852_v37  ;;  %888 = vst [vmem:[%s5027_s19 + $0xb0] sm:$0xff] %v859_v38  ;;  %v902_v51 = vpack.c.bf16 %v859_v38, %v852_v37  ;;  %v858_v55 = vadd.f32 %v830_v34, %v802_v45  ;;  %v797_v57 = vmul.f32 0.5, %v769_v48  ;;  %v822_v34 = vld [vmem:[%s5007_s22 + $0x68] sm:$0xff]  ;;  %v744_v37 = vld [vmem:[%s5002_s27 + $0x98] sm:$0xff] }
  0x7c   : > { %3881 = vmatprep.subr.bf16.mxu0 %v4167_v6  ;;  %1395 = vmatmul.mubr.bf16.vlgmr.msra.gmra.mxu1 %v896_v16  ;;  %v861_v62 = vadd.f32 %v833_v47, %v805_v56  ;;  %v4178_v6 = vld [vmem:[#allocation2 + $0x108] sm:$0xff]   ;;  %v757_v16 = vadd.f32 1.0, %v729_v13  ;;  %v801_v47 = vmul.f32 0.5, %v773_v35  ;;  %v772_v48 = vadd.f32 1.0, %v744_v37  ;;  %v827_v56 = vld [vmem:[%s5007_s22 + $0x90] sm:$0xff] }
  0x7d   : > { %1353 = vmatprep.mubr.bf16.mxu0 %v902_v51  ;;  %887 = vst [vmem:[%s5027_s19 + $0xa8] sm:$0xff] %v858_v55  ;;  %v901_v61 = vpack.c.bf16 %v858_v55, %v851_v52  ;;  %v853_v63 = vadd.f32 %v825_v50, %v797_v57  ;;  %3951 = vmatpush3.bf16.msra.mxu1 %v4179_v4  ;;  %v743_v50 = vld [vmem:[%s5002_s27 + $0x90] sm:$0xff]  ;;  %v750_v51 = vld [vmem:[%s5002_s27 + $0xc8] sm:$0xff]  ;;  %v779_v55 = vadd.f32 1.0, %v751_v43 }
  0x7e   : > { %890 = vst [vmem:[%s5027_s19 + $0xc0] sm:$0xff] %v861_v62  ;;  %v904_v2 = vpack.c.bf16 %v861_v62, %v854_v60  ;;  %v785_v25 = vmul.f32 0.5, %v757_v16  ;;  %v5090_v52 = vadd.f32 %v815_v28, %v787_v39  ;;  %v5096_v58 = vadd.f32 %v829_v36, %v801_v47  ;;  %3956 = vmatprep.subr.bf16.mxu1 %v4182_v11  ;;  %v4184_v13 = vld [vmem:[#allocation5 + $0x28] sm:$0xff]   ;;  %v4187_v16 = vld [vmem:[#allocation5 + $0x10] sm:$0xff]  }
  0x7f   : > { %3882 = vmatpush3.bf16.msra.mxu0 %v4168_v14  ;;  %882 = vst [vmem:[%s5027_s19 + $0x80] sm:$0xff] %v853_v63  ;;  %v903_v3 = vpack.c.bf16 %v860_v0, %v853_v63  ;;  %v821_v14 = vld [vmem:[%s5007_s22 + $0x60] sm:$0xff]  ;;  %v771_v60 = vadd.f32 1.0, %v743_v50  ;;  %v5107_v63 = vadd.f32 %v836_v42, %v808_v54  ;;  %v807_v0 = vmul.f32 0.5, %v779_v55 }
  0x80   : > { %3883 = vmatprep.subr.bf16.mxu0 %v4169_v15  ;;  %1402 = vmatprep.mubr.bf16.mxu1 %v904_v2  ;;  %v736_v15 = vld [vmem:[%s5002_s27 + $0x58] sm:$0xff]  ;;  %v849_v32 = vadd.f32 %v821_v14, %v793_v19  ;;  %872 = vst.msk [vmem:[%s5027_s19 + $0x30] sm:$0xff] %vm871_vm0, %v5090_v52  ;;  %886 = vst.msk [vmem:[%s5027_s19 + $0xa0] sm:$0xff] %vm871_vm0, %v5096_v58  ;;  %v4185_v14 = vld [vmem:[#allocation5 + $0x20] sm:$0xff]   ;;  %s4037_s27 = smul.u32 112, %s5010_s29 }
  0x81   : > { %6140 = vst [vmem:[#allocation25_spill] sm:$0xff] %v5107_v63  ;;  %893 = vst.msk [vmem:[%s5027_s19 + $0xd8] sm:$0xff] %vm871_vm0, %v5107_v63  ;;  %v907_v4 = vpack.c.bf16 %v5107_v63, %v5096_v58 }
  0x82   : > { %1354 = vmatmul.mubr.bf16.gmra.mxu0 %v901_v61  ;;  %878 = vst [vmem:[%s5027_s19 + $0x60] sm:$0xff] %v849_v32  ;;  %v899_v45 = vpack.c.bf16 %v849_v32, %v842_v31  ;;  %v834_v61 = vld [vmem:[%s5007_s22 + $0xc8] sm:$0xff]  ;;  %s5710_s30 = scalar_lea.vmem [#allocation11], %s4037_s27  ;;  %s4773_s27 = smov [#allocation10]  }
  0x83   : > { %3884 = vmatpush3.bf16.msra.mxu0 %v4170_v17  ;;  %v813_v17 = vld [vmem:[%s5007_s22 + $0x20] sm:$0xff] }
  0x84   : > { %3885 = vmatprep.subr.bf16.mxu0 %v4171_v20  ;;  %1403 = vmatmul.mubr.bf16.gmra.mxu1 %v903_v3  ;;  %v764_v20 = vadd.f32 1.0, %v736_v15  ;;  %v841_v38 = vadd.f32 %v813_v17, %v785_v25  ;;  %v799_v3 = vmul.f32 0.5, %v771_v60  ;;  %v4186_v15 = vld [vmem:[#allocation5 + $0x18] sm:$0xff]   ;;  %v4188_v17 = vld [vmem:[#allocation5 + $0x8] sm:$0xff]  }
  0x85   : > { %1443 = vmatprep.mubr.bf16.mxu0 %v899_v45 }
  0x86   : > { %v792_v33 = vmul.f32 0.5, %v764_v20  ;;  %869 = vst [vmem:[%s5027_s19 + $0x20] sm:$0xff] %v841_v38  ;;  %v855_v7 = vadd.f32 %v827_v56, %v799_v3 }
  0x87   : > { %3886 = vmatpush3.bf16.msra.mxu0 %v4172_v24  ;;  %v4181_v24 = vld [vmem:[#allocation2 + $0x100] sm:$0xff]  }
  0x88   : > { %3887 = vmatprep.subr.bf16.mxu0 %v4173_v27  ;;  %v766_v27 = vadd.f32 1.0, %v738_v23  ;;  %v848_v46 = vadd.f32 %v820_v21, %v792_v33  ;;  %884 = vst [vmem:[%s5027_s19 + $0x90] sm:$0xff] %v855_v7 }
  0x8a   : > { %v794_v40 = vmul.f32 0.5, %v766_v27  ;;  %877 = vst [vmem:[%s5027_s19 + $0x58] sm:$0xff] %v848_v46  ;;  %v898_v57 = vpack.c.bf16 %v848_v46, %v841_v38 }
  0x8b   : > { %3888 = vmatpush3.bf16.msra.mxu0 %v4174_v44  ;;  %v828_v44 = vld [vmem:[%s5007_s22 + $0x98] sm:$0xff] }
  0x8c   : > { %3889 = vmatprep.subr.bf16.mxu0 %v4175_v59  ;;  %v5092_v53 = vadd.f32 %v822_v34, %v794_v40  ;;  %v800_v59 = vmul.f32 0.5, %v772_v48  ;;  %v3620_v34 = vld [vmem:[%s6141_s4] ss:$0 sm:$0xff]  ;;  %s4666_s4 = sshll.u32 %s4773_s27, 4  ;;  %s4667_s4 = int_to_ptr.vmem [resolvable:$false] %s4666_s4 }
  0x8d   : > { %p4669_p4 = scmp.lt.s32.totalorder %s5991_s21, %s4667_s4 }
  0x8e   : > { %6139 = vst [vmem:[#allocation24_spill] sm:$0xff] %v5092_v53  ;;  %879 = vst.msk [vmem:[%s5027_s19 + $0x68] sm:$0xff] %vm871_vm0, %v5092_v53  ;;  %v900_v62 = vpack.c.bf16 %v5092_v53, %v5090_v52  ;;  %v856_v2 = vadd.f32 %v828_v44, %v800_v59 }
  0x8f   : > { %3890 = vmatpush3.bf16.msra.mxu0 %v4176_v1  ;;  %v778_v1 = vadd.f32 1.0, %v750_v51 }
  0x90   : > { %3891 = vmatprep.subr.bf16.mxu0 %v4177_v5  ;;  %3952 = vmatprep.mubr.msk.bf16.mxu1 %vm871_vm0, %v900_v62  ;;  %v863_v5 = vadd.f32 %v835_v49, %v807_v0  ;;  %885 = vst [vmem:[%s5027_s19 + $0x98] sm:$0xff] %v856_v2 }
  0x91   : > { %3953 = vmatmul.mubr.msk.bf16.vlgmr.msra.gmra.mxu1 %vm871_vm0, %v907_v4 }
  0x92   : > { %892 = vst [vmem:[%s5027_s19 + $0xd0] sm:$0xff] %v863_v5  ;;  %v906_v8 = vpack.c.bf16 %v863_v5, %v856_v2  ;;  %3957 = vmatpush3.bf16.msra.mxu1 %v4182_v11 }
  0x93   : > { %3892 = vmatpush3.bf16.msra.mxu0 %v4178_v6  ;;  %v806_v6 = vmul.f32 0.5, %v778_v1  ;;  %3958 = vmatprep.subr.bf16.mxu1 %v4183_v12 }
  0x94   : > { %3893 = vmatprep.subr.bf16.mxu0 %v4180_v9 }
  0x95   : > { %v862_v9 = vadd.f32 %v834_v61, %v806_v6 }
  0x96   : > { %3959 = vmatpush3.bf16.msra.mxu1 %v4183_v12 }
  0x97   : > { %3894 = vmatpush3.bf16.msra.mxu0 %v4181_v24  ;;  %891 = vst [vmem:[%s5027_s19 + $0xc8] sm:$0xff] %v862_v9  ;;  %v905_v10 = vpack.c.bf16 %v862_v9, %v855_v7  ;;  %3960 = vmatprep.subr.bf16.mxu1 %v4184_v13 }
  0x9a   : > { %1444 = vmatmul.mubr.bf16.vlgmr.msra.gmra.mxu0 %v898_v57  ;;  %3961 = vmatpush3.bf16.msra.mxu1 %v4184_v13 }
  0x9b   : > { %1451 = vmatprep.mubr.bf16.mxu0 %v906_v8  ;;  %3962 = vmatprep.subr.bf16.mxu1 %v4185_v14 }
  0x9e   : > { %3963 = vmatpush3.bf16.msra.mxu1 %v4185_v14 }
  0x9f   : > { %3964 = vmatprep.subr.bf16.mxu1 %v4186_v15 }
  0xa2   : > { %1452 = vmatmul.mubr.bf16.gmra.mxu0 %v905_v10  ;;  %3965 = vmatpush3.bf16.msra.mxu1 %v4186_v15 }
  0xa3   : > { %3966 = vmatprep.subr.bf16.mxu1 %v4187_v16 }
  0xa6   : > { %3967 = vmatpush3.bf16.msra.mxu1 %v4187_v16 }
  0xa7   : > { %3968 = vmatprep.subr.bf16.mxu1 %v4188_v17 }
  0xaa   : > { %3969 = vmatpush3.bf16.msra.mxu1 %v4188_v17 }
  0xab   : > { %3970 = vmatprep.subr.bf16.mxu1 %v4189_v18 }
  0xae   : > { %3971 = vmatpush3.bf16.msra.mxu1 %v4189_v18 }
 0x13a   : > { %v3839_v19 = vpop.f32.mrf.mxu0 }
 0x13c   : > { %v3867_v20 = vpop.f32.mrf.mxu1  ;;  %v3840_v21 = vpop.f32.mrf.mxu0 }
 0x13d   : > { %v3841_v32 = vadd.f32 %v3840_v21, %v3839_v19 }
 0x13e   : > { %v3868_v22 = vpop.f32.mrf.mxu1  ;;  %v3842_v23 = vpop.f32.mrf.mxu0 }
 0x13f   : > { %v1348_v36 = vadd.f32 %v3841_v32, %v3620_v34  ;;  %v3869_v37 = vadd.f32 %v3868_v22, %v3867_v20  ;;  %v4192_v22 = vld [vmem:[%s6081_s7 + $0x74] ss:$8 sps:$4 sm:$0xff]   ;;  %v4207_v32 = vld [vmem:[%s6081_s7 + $0x24] ss:$8 sps:$4 sm:$0xff]  }
 0x140   : > { %v3870_v24 = vpop.f32.mrf.mxu1  ;;  %v3843_v25 = vpop.f32.mrf.mxu0  ;;  %1769 = vmatprep.subr.bf16.mxu0 %v4192_v22 }
 0x141   : > { %v3844_v38 = vadd.f32 %v3843_v25, %v3842_v23  ;;  %v1397_v44 = vadd.f32 %v3869_v37, %v1348_v36  ;;  %v4190_v23 = vld [vmem:[%s6081_s7 + $0x70] ss:$8 sps:$4 sm:$0xff]   ;;  %v4193_v25 = vld [vmem:[%s6081_s7 + $0x60] ss:$8 sps:$4 sm:$0xff]   ;;  %v4213_v36 = vld [vmem:[%s6081_s7 + $0x4] ss:$8 sps:$4 sm:$0xff]  }
 0x142   : > { %v3871_v26 = vpop.f32.mrf.mxu1  ;;  %v3845_v27 = vpop.f32.mrf.mxu0  ;;  %1770 = vmatpush1.bf16.msra.mxu0 %v4190_v23  ;;  %v4211_v37 = vld [vmem:[%s6081_s7] ss:$8 sps:$4 sm:$0xff]  }
 0x143   : > { %v1351_v45 = vadd.f32 %v3844_v38, %v3620_v34  ;;  %v3872_v46 = vadd.f32 %v3871_v26, %v3870_v24  ;;  %v4195_v24 = vld [vmem:[%s6081_s7 + $0x64] ss:$8 sps:$4 sm:$0xff]   ;;  %v4198_v26 = vld [vmem:[%s6081_s7 + $0x54] ss:$8 sps:$4 sm:$0xff]   ;;  %v4772_v38 = vmov 0  }
 0x144   : > { %v3873_v28 = vpop.f32.mrf.mxu1  ;;  %v3846_v29 = vpop.f32.mrf.mxu0  ;;  %1771 = vmatprep.subr.bf16.mxu0 %v4195_v24  ;;  %1801 = vmatprep.mubr.bf16.mxu0 %v4772_v38 }
 0x145   : > { %v3847_v42 = vadd.f32 %v3846_v29, %v3845_v27  ;;  %v1400_v57 = vadd.f32 %v3872_v46, %v1351_v45  ;;  %v4196_v27 = vld [vmem:[%s6081_s7 + $0x50] ss:$8 sps:$4 sm:$0xff]   ;;  %v4199_v29 = vld [vmem:[%s6081_s7 + $0x40] ss:$8 sps:$4 sm:$0xff]  }
 0x146   : > { %v3874_v30 = vpop.f32.mrf.mxu1  ;;  %v3848_v31 = vpop.f32.mrf.mxu0  ;;  %1772 = vmatpush1.bf16.msra.mxu0 %v4193_v25 }
 0x147   : > { %v1356_v54 = vadd.f32 %v3847_v42, %v3620_v34  ;;  %v3875_v55 = vadd.f32 %v3874_v30, %v3873_v28  ;;  %1773 = vmatprep.subr.bf16.mxu0 %v4198_v26  ;;  %v4201_v28 = vld [vmem:[%s6081_s7 + $0x44] ss:$8 sps:$4 sm:$0xff]   ;;  %v4204_v30 = vld [vmem:[%s6081_s7 + $0x34] ss:$8 sps:$4 sm:$0xff]  }
 0x148   : > { %v3876_v33 = vpop.f32.mrf.mxu1  ;;  %v3849_v35 = vpop.f32.mrf.mxu0 }
 0x149   : > { %v3850_v59 = vadd.f32 %v3849_v35, %v3848_v31  ;;  %v1405_v2 = vadd.f32 %v3875_v55, %v1356_v54  ;;  %v4202_v31 = vld [vmem:[%s6081_s7 + $0x30] ss:$8 sps:$4 sm:$0xff]  }
 0x14a   : > { %v3877_v39 = vpop.f32.mrf.mxu1  ;;  %1774 = vmatpush1.bf16.msra.mxu0 %v4196_v27  ;;  %v4208_v35 = vld [vmem:[%s6081_s7 + $0x10] ss:$8 sps:$4 sm:$0xff]  }
 0x14b   : > { %v1359_v4 = vadd.f32 %v3850_v59, %v3620_v34  ;;  %v3878_v5 = vadd.f32 %v3877_v39, %v3876_v33  ;;  %1775 = vmatprep.subr.bf16.mxu0 %v4201_v28  ;;  %v4205_v33 = vld [vmem:[%s6081_s7 + $0x20] ss:$8 sps:$4 sm:$0xff]   ;;  %v4210_v34 = vld [vmem:[%s6081_s7 + $0x14] ss:$8 sps:$4 sm:$0xff]  }
 0x14d   : > { %v1408_v11 = vadd.f32 %v3878_v5, %v1359_v4 }
 0x14e   : > { %1776 = vmatpush1.bf16.msra.mxu0 %v4199_v29 }
 0x14f   : > { %1777 = vmatprep.subr.bf16.mxu0 %v4204_v30 }
 0x151   : > { %v3954_v41 = vpop.f32.mrf.mxu1 }
 0x152   : > { %1778 = vmatpush1.bf16.msra.mxu0 %v4202_v31 }
 0x153   : > { %v1494_v48 = vpop.f32.mrf.mxu1  ;;  %1779 = vmatprep.subr.bf16.mxu0 %v4207_v32 }
 0x155   : > { %v3955_v51 = vpop.f32.mrf.mxu1 }
 0x156   : > { %1780 = vmatpush1.bf16.msra.mxu0 %v4205_v33 }
 0x157   : > { %v1497_v0 = vpop.f32.mrf.mxu1  ;;  %1781 = vmatprep.subr.bf16.mxu0 %v4210_v34 }
 0x15a   : > { %v3895_v40 = vpop.f32.mrf.mxu0  ;;  %1782 = vmatpush1.bf16.msra.mxu0 %v4208_v35 }
 0x15b   : > { %1783 = vmatprep.subr.bf16.mxu0 %v4213_v36 }
 0x15c   : > { %v3896_v43 = vpop.f32.mrf.mxu0 }
 0x15d   : > { %v3897_v47 = vadd.f32 %v3896_v43, %v3895_v40  ;;  %v3672_v40 = vld [vmem:[%s6142_s6] ss:$0 sm:$0xff] }
 0x15e   : > { %v3898_v49 = vpop.f32.mrf.mxu0  ;;  %1784 = vmatpush1.bf16.msra.mxu0 %v4211_v37 }
 0x15f   : > { %v1446_v50 = vadd.f32 %v3897_v47, %v1397_v44 }
 0x160   : > { %v3899_v56 = vpop.f32.mrf.mxu0 }
 0x161   : > { %v3900_v60 = vadd.f32 %v3899_v56, %v3898_v49  ;;  %v1495_v61 = vadd.f32 %v1494_v48, %v1446_v50 }
 0x162   : > { %v3901_v62 = vpop.f32.mrf.mxu0 }
 0x163   : > { %v1449_v1 = vadd.f32 %v3900_v60, %v1400_v57  ;;  %4310 = vtanh.f32 %v1495_v61 }
 0x164   : > { %v3902_v3 = vpop.f32.mrf.mxu0 }
 0x165   : > { %v3903_v6 = vadd.f32 %v3902_v3, %v3901_v62  ;;  %v1498_v7 = vadd.f32 %v1497_v0, %v1449_v1 }
 0x166   : > { %v3904_v8 = vpop.f32.mrf.mxu0 }
 0x167   : > { %v1454_v9 = vadd.f32 %v3903_v6, %v1405_v2  ;;  %4312 = vtanh.f32 %v1498_v7 }
 0x168   : > { %v3905_v10 = vpop.f32.mrf.mxu0 }
 0x169   : > { %v3906_v12 = vadd.f32 %v3905_v10, %v3904_v8  ;;  %v1503_v13 = vadd.f32 %v3954_v41, %v1454_v9  ;;  %v4214_v10 = vld [vmem:[#allocation7 + $0x38] sm:$0xff]  }
 0x16a   : > { %3976 = vmatprep.subr.bf16.mxu1 %v4214_v10 }
 0x16b   : > { %v1457_v14 = vadd.f32 %v3906_v12, %v1408_v11  ;;  %4314 = vtanh.f32 %v1503_v13  ;;  %v4215_v11 = vld [vmem:[#allocation7 + $0x30] sm:$0xff]   ;;  %v4216_v12 = vld [vmem:[#allocation7 + $0x28] sm:$0xff]   ;;  %v4217_v13 = vld [vmem:[#allocation7 + $0x20] sm:$0xff]  }
 0x16d   : > { %v1506_v15 = vadd.f32 %v3955_v51, %v1457_v14  ;;  %v4218_v14 = vld [vmem:[#allocation7 + $0x18] sm:$0xff]  }
 0x16f   : > { %4316 = vtanh.f32 %v1506_v15  ;;  %v4219_v15 = vld [vmem:[#allocation7 + $0x10] sm:$0xff]  }
 0x170   : > { %v4311_v16 = vpop.eup %4310 }
 0x174   : > { %v4313_v17 = vpop.eup %4312 }
 0x175   : > { %v1513_v18 = vpack.c.bf16 %v4313_v17, %v4311_v16  ;;  %v4220_v16 = vld [vmem:[#allocation7 + $0x8] sm:$0xff]   ;;  %v4221_v17 = vld [vmem:[#allocation7] sm:$0xff]  }
 0x177   : > { %3972 = vmatprep.mubr.bf16.mxu1 %v1513_v18  ;;  %v1679_v18 = vlaneseq }
 0x178   : > { %v4315_v19 = vpop.eup %4314 }
 0x17c   : > { %v4317_v20 = vpop.eup %4316 }
 0x17d   : > { %v1514_v21 = vpack.c.bf16 %v4317_v20, %v4315_v19  ;;  %v5180_v19 = vshrl.u32 %v1679_v18, 7 }
 0x17f   : > { %3973 = vmatmul.mubr.bf16.vlgmr.msra.gmra.mxu1 %v1514_v21  ;;  %v1685_v20 = vsub.s32 1, %v5180_v19  ;;  %v1677_v21 = vld [vmem:[%s6082_s8] sm:$0x3] }
 0x180   : > { %3977 = vmatpush3.bf16.msra.mxu1 %v4214_v10 }
 0x181   : > { %3978 = vmatprep.subr.bf16.mxu1 %v4215_v11  ;;  %v1686_v22 = vrot.slane %v1677_v21, %v1685_v20 }
 0x184   : > { %3979 = vmatpush3.bf16.msra.mxu1 %v4215_v11 }
 0x185   : > { %3980 = vmatprep.subr.bf16.mxu1 %v4216_v12 }
 0x188   : > { %3981 = vmatpush3.bf16.msra.mxu1 %v4216_v12 }
 0x189   : > { %3982 = vmatprep.subr.bf16.mxu1 %v4217_v13 }
 0x18c   : > { %3983 = vmatpush3.bf16.msra.mxu1 %v4217_v13 }
 0x18d   : > { %3984 = vmatprep.subr.bf16.mxu1 %v4218_v14 }
 0x190   : > { %3985 = vmatpush3.bf16.msra.mxu1 %v4218_v14 }
 0x191   : > { %3986 = vmatprep.subr.bf16.mxu1 %v4219_v15 }
 0x194   : > { %3987 = vmatpush3.bf16.msra.mxu1 %v4219_v15 }
 0x195   : > { %3988 = vmatprep.subr.bf16.mxu1 %v4220_v16 }
 0x198   : > { %3989 = vmatpush3.bf16.msra.mxu1 %v4220_v16 }
 0x199   : > { %3990 = vmatprep.subr.bf16.mxu1 %v4221_v17 }
 0x19c   : > { %3991 = vmatpush3.bf16.msra.mxu1 %v4221_v17 }
 0x23f   : > { %v3974_v39 = vpop.f32.mrf.mxu1 }
 0x240   : > { %v1629_v46 = vadd.f32 %v3974_v39, %v3672_v40 }
 0x241   : > { %v1620_v41 = vpop.f32.mrf.mxu1 }
 0x242   : > { %v1621_v42 = vadd.f32 %v3672_v40, %v1620_v41  ;;  %v1641_v51 = vmin.f32 %v1629_v46, 0.0  ;;  %vm1637_vm4 = vcmp.gt.f32.partialorder %v1629_v46, 0.0 }
 0x243   : > { %v3975_v43 = vpop.f32.mrf.mxu1 }
 0x244   : > { %v1639_v44 = vmin.f32 %v1621_v42, 0.0  ;;  %v1632_v45 = vadd.f32 %v3975_v43, %v3672_v40  ;;  %v1647_v57 = vmul.f32 1.442695, %v1641_v51  ;;  %vm1635_vm1 = vcmp.gt.f32.partialorder %v1621_v42, 0.0 }
 0x245   : > { %v1623_v47 = vpop.f32.mrf.mxu1 }
 0x246   : > { %v1643_v48 = vmul.f32 1.442695, %v1639_v44  ;;  %v1642_v49 = vmin.f32 %v1632_v45, 0.0  ;;  %v1624_v50 = vadd.f32 %v3672_v40, %v1623_v47  ;;  %vm1638_vm3 = vcmp.gt.f32.partialorder %v1632_v45, 0.0 }
 0x248   : > { %4318 = vpow2.f32 %v1643_v48  ;;  %v1640_v54 = vmin.f32 %v1624_v50, 0.0  ;;  %v1649_v55 = vmul.f32 1.442695, %v1642_v49  ;;  %vm1636_vm2 = vcmp.gt.f32.partialorder %v1624_v50, 0.0 }
 0x24a   : > { %v1645_v56 = vmul.f32 1.442695, %v1640_v54 }
 0x24c   : > { %4320 = vpow2.f32 %v1645_v56 }
 0x24d   : > { %4322 = vpow2.f32 %v1649_v55  ;;  %v1681_v55 = vsub.s32 0, %v5180_v19 }
 0x24e   : > { %4324 = vpow2.f32 %v1647_v57 }
 0x255   : > { %v4319_v59 = vpop.eup %4318 }
 0x256   : > { %v3681_v60 = vadd.f32 -1.0, %v4319_v59 }
 0x258   : > { %v1655_v1 = vsel %vm1635_vm1, %v1621_v42, %v3681_v60 }
 0x259   : > { %v4321_v61 = vpop.eup %4320 }
 0x25a   : > { %v3682_v62 = vadd.f32 -1.0, %v4321_v61  ;;  %v4323_v0 = vpop.eup %4322  ;;  %v1682_v61 = vrot.slane %v1677_v21, %v1681_v55 }
 0x25b   : > { %v4325_v3 = vpop.eup %4324  ;;  %v3684_v5 = vadd.f32 -1.0, %v4323_v0 }
 0x25c   : > { %v1656_v2 = vsel %vm1636_vm2, %v1624_v50, %v3682_v62  ;;  %v3683_v6 = vadd.f32 -1.0, %v4325_v3  ;;  %v1858_v62 = vld [vmem:[%s5200_s23] sm:$0xff]  ;;  %v1859_v3 = vld [vmem:[%s5200_s23 + $0x8] sm:$0xff] }
 0x25d   : > { %v1659_v4 = vpack.c.bf16 %v1656_v2, %v1655_v1  ;;  %v1658_v7 = vsel %vm1638_vm3, %v1632_v45, %v3684_v5 }
 0x25e   : > { %v1657_v8 = vsel %vm1637_vm4, %v1629_v46, %v3683_v6 }
 0x25f   : > { %1802 = vmatmul.mubr.bf16.vlgmr.msra.gmra.mxu0 %v1659_v4  ;;  %v1660_v9 = vpack.c.bf16 %v1658_v7, %v1657_v8 }
 0x260   : > { %1811 = vmatprep.mubr.bf16.mxu0 %v4772_v38 }
 0x267   : > { %1812 = vmatmul.mubr.bf16.gmra.mxu0 %v1660_v9 }
 0x31f   : > { %v1803_v23 = vpop.f32.mrf.mxu0 }
 0x320   : > { %v1804_v8 = vadd.f32 %v1803_v23, %v1682_v61 }
 0x321   : > { %v1805_v24 = vpop.f32.mrf.mxu0 }
 0x322   : > { %v1806_v25 = vadd.f32 %v1805_v24, %v1686_v22 }
 0x323   : > { %v1807_v26 = vpop.f32.mrf.mxu0 }
 0x324   : > { %v1826_v27 = vmin.f32 %v1806_v25, 20.0  ;;  %vm1822_vm5 = vcmp.gt.f32.partialorder %v1806_v25, 20.0  ;;  %v1808_v9 = vadd.f32 %v1807_v26, %v1682_v61  ;;  %v1861_v26 = vld [vmem:[%s5200_s23 + $0x18] sm:$0xff] }
 0x325   : > { %v1809_v28 = vpop.f32.mrf.mxu0 }
 0x326   : > { %v1830_v29 = vmul.f32 1.442695, %v1826_v27  ;;  %v1810_v30 = vadd.f32 %v1809_v28, %v1686_v22 }
 0x327   : > { %v5188_v31 = vpop.f32.mrf.mxu0 }
 0x328   : > { %4326 = vpow2.f32 %v1830_v29  ;;  %v1827_v32 = vmin.f32 %v1810_v30, 20.0  ;;  %vm1823_vm6 = vcmp.gt.f32.partialorder %v1810_v30, 20.0 }
 0x329   : > { %v1815_v33 = vpop.f32.mrf.mxu0 }
 0x32a   : > { %v1832_v34 = vmul.f32 1.442695, %v1827_v32  ;;  %v1816_v35 = vadd.f32 %v1815_v33, %v1686_v22  ;;  %v1814_v32 = vadd.f32 %v5188_v31, %v1682_v61  ;;  %v3287_v31 = vmul.f32 %v1808_v9, %v1808_v9 }
 0x32b   : > { %v5190_v36 = vpop.f32.mrf.mxu0 }
 0x32c   : > { %4328 = vpow2.f32 %v1832_v34  ;;  %v1828_v37 = vmin.f32 %v1816_v35, 20.0  ;;  %vm1824_vm7 = vcmp.gt.f32.partialorder %v1816_v35, 20.0  ;;  %v1818_v33 = vadd.f32 %v5190_v36, %v1682_v61 }
 0x32d   : > { %v1819_v39 = vpop.f32.mrf.mxu0 }
 0x32e   : > { %v1834_v40 = vmul.f32 1.442695, %v1828_v37  ;;  %v1820_v41 = vadd.f32 %v1819_v39, %v1686_v22  ;;  %v1860_v22 = vld [vmem:[%s5200_s23 + $0x10] sm:$0xff]  ;;  %v3289_v61 = vmul.f32 %v1818_v33, %v1818_v33 }
 0x330   : > { %4330 = vpow2.f32 %v1834_v40  ;;  %v1829_v42 = vmin.f32 %v1820_v41, 20.0  ;;  %vm1825_vm8 = vcmp.gt.f32.partialorder %v1820_v41, 20.0 }
 0x332   : > { %v1836_v43 = vmul.f32 1.442695, %v1829_v42  ;;  %v3286_v42 = vmul.f32 %v1804_v8, %v1804_v8 }
 0x334   : > { %4332 = vpow2.f32 %v1836_v43 }
 0x335   : > { %v4327_v44 = vpop.eup %4326 }
 0x336   : > { %v1838_v45 = vadd.f32 1.0, %v4327_v44 }
 0x338   : > { %4334 = vlog2.f32 %v1838_v45 }
 0x339   : > { %v4329_v46 = vpop.eup %4328 }
 0x33a   : > { %v1839_v47 = vadd.f32 1.0, %v4329_v46 }
 0x33c   : > { %4336 = vlog2.f32 %v1839_v47 }
 0x33d   : > { %v4331_v48 = vpop.eup %4330 }
 0x33e   : > { %v1840_v49 = vadd.f32 1.0, %v4331_v48 }
 0x340   : > { %4338 = vlog2.f32 %v1840_v49 }
 0x341   : > { %v4333_v50 = vpop.eup %4332 }
 0x342   : > { %v1841_v51 = vadd.f32 1.0, %v4333_v50 }
 0x344   : > { %4340 = vlog2.f32 %v1841_v51  ;;  %v3288_v51 = vmul.f32 %v1814_v32, %v1814_v32 }
 0x345   : > { %v4335_v54 = vpop.eup %4334 }
 0x346   : > { %v1843_v56 = vmul.f32 0.6931472, %v4335_v54 }
 0x348   : > { %v1850_v57 = vsel %vm1822_vm5, %v1806_v25, %v1843_v56 }
 0x349   : > { %v4337_v59 = vpop.eup %4336  ;;  %v1854_v60 = vadd.f32 1e-06, %v1850_v57 }
 0x34a   : > { %v1845_v0 = vmul.f32 0.6931472, %v4337_v59 }
 0x34b   : > { %v3281_v1 = vmul.f32 %v1854_v60, %v1854_v60  ;;  %v1862_v5 = vmul.f32 %v1858_v62, %v1854_v60 }
 0x34c   : > { %v1851_v2 = vsel %vm1823_vm6, %v1810_v30, %v1845_v0 }
 0x34d   : > { %v4339_v4 = vpop.eup %4338  ;;  %v1855_v6 = vadd.f32 1e-06, %v1851_v2  ;;  %v3294_v7 = vadd.f32 1e-07, %v3281_v1  ;;  %v1866_v16 = vadd.f32 %v1862_v5, %v1804_v8  ;;  %v3290_v45 = vadd.f32 %v3286_v42, %v3281_v1 }
 0x34e   : > { %v1847_v10 = vmul.f32 0.6931472, %v4339_v4 }
 0x34f   : > { %v1863_v11 = vmul.f32 %v1859_v3, %v1855_v6  ;;  %4342 = vlog2.f32 %v3294_v7  ;;  %v3282_v12 = vmul.f32 %v1855_v6, %v1855_v6 }
 0x350   : > { %v1852_v13 = vsel %vm1824_vm7, %v1816_v35, %v1847_v10  ;;  %v4223_v10 = vld [vmem:[#allocation8 + $0x30] sm:$0xff]  }
 0x351   : > { %v4341_v14 = vpop.eup %4340  ;;  %v1856_v15 = vadd.f32 1e-06, %v1852_v13  ;;  %v1867_v17 = vadd.f32 %v1863_v11, %v1808_v9  ;;  %v3295_v21 = vadd.f32 1e-07, %v3282_v12  ;;  %v3291_v49 = vadd.f32 %v3287_v31, %v3282_v12  ;;  %v4222_v9 = vld [vmem:[#allocation8 + $0x38] sm:$0xff]   ;;  %v4224_v11 = vld [vmem:[#allocation8 + $0x28] sm:$0xff]  }
 0x352   : > { %v1849_v24 = vmul.f32 0.6931472, %v4341_v14  ;;  %3996 = vmatprep.subr.bf16.mxu0 %v4222_v9  ;;  %v4225_v12 = vld [vmem:[#allocation8 + $0x20] sm:$0xff]   ;;  %v4226_v13 = vld [vmem:[#allocation8 + $0x18] sm:$0xff]   ;;  %v4227_v14 = vld [vmem:[#allocation8 + $0x10] sm:$0xff]  }
 0x353   : > { %v1870_v25 = vpack.c.bf16 %v1867_v17, %v1866_v16  ;;  %4344 = vlog2.f32 %v3295_v21  ;;  %v3283_v27 = vmul.f32 %v1856_v15, %v1856_v15  ;;  %v1864_v28 = vmul.f32 %v1860_v22, %v1856_v15  ;;  %3997 = vmatpush3.bf16.msra.mxu0 %v4222_v9  ;;  %v4228_v15 = vld [vmem:[#allocation8 + $0x8] sm:$0xff]   ;;  %v4229_v16 = vld [vmem:[#allocation8] sm:$0xff]   ;;  %v4271_v9 = vld [vmem:[%s6087_s13 + $0x44] ss:$28 sps:$4 sm:$0xff]  }
 0x354   : > { %v1853_v23 = vsel %vm1825_vm8, %v1820_v41, %v1849_v24  ;;  %v3280_v41 = vand.u32 127, %v1679_v18  ;;  %3998 = vmatprep.subr.bf16.mxu0 %v4223_v10  ;;  %v4230_v17 = vld [vmem:[%s6087_s13 + $0x188] ss:$28 sps:$4 sm:$0xff]   ;;  %v4235_v22 = vld [vmem:[%s6087_s13 + $0x194] ss:$28 sps:$4 sm:$0xff]  }
 0x355   : > { %v1857_v29 = vadd.f32 1e-06, %v1853_v23  ;;  %3992 = vmatprep.mubr.bf16.mxu1 %v1870_v25  ;;  %v3296_v30 = vadd.f32 1e-07, %v3283_v27  ;;  %v1868_v37 = vadd.f32 %v1864_v28, %v1814_v32  ;;  %v3292_v18 = vadd.f32 %v3288_v51, %v3283_v27  ;;  %v4232_v21 = vld [vmem:[%s6087_s13 + $0x18c] ss:$28 sps:$4 sm:$0xff]  }
 0x356   : > { %vm3285_vm9 = vcmp.lt.s32.totalorder %v3280_v41, 2  ;;  %2533 = vmatprep.subr.bf16.mxu1 %v4232_v21  ;;  %v4239_v51 = vld [vmem:[%s6087_s13 + $0x158] ss:$28 sps:$4 sm:$0xff]  }
 0x357   : > { %v1865_v34 = vmul.f32 %v1861_v26, %v1857_v29  ;;  %4346 = vlog2.f32 %v3296_v30  ;;  %v3284_v35 = vmul.f32 %v1857_v29, %v1857_v29  ;;  %3999 = vmatpush3.bf16.msra.mxu0 %v4223_v10  ;;  %v4266_v10 = vld [vmem:[%s6087_s13 + $0x38] ss:$28 sps:$4 sm:$0xff]  }
 0x358   : > { %4000 = vmatprep.subr.bf16.mxu0 %v4224_v11 }
 0x359   : > { %v1869_v39 = vadd.f32 %v1865_v34, %v1818_v33  ;;  %v3297_v40 = vadd.f32 1e-07, %v3284_v35  ;;  %v3293_v3 = vadd.f32 %v3289_v61, %v3284_v35  ;;  %v3701_v33 = vld [vmem:[%s6084_s10] ss:$0 sm:$0xff] }
 0x35a   : > { %v4248_v61 = vld [vmem:[%s6087_s13 + $0xe0] ss:$28 sps:$4 sm:$0xff]  }
 0x35b   : > { %v1871_v43 = vpack.c.bf16 %v1869_v39, %v1868_v37  ;;  %4348 = vlog2.f32 %v3297_v40  ;;  %4001 = vmatpush3.bf16.msra.mxu0 %v4224_v11  ;;  %v4269_v11 = vld [vmem:[%s6087_s13 + $0x40] ss:$28 sps:$4 sm:$0xff]  }
 0x35c   : > { %v4343_v44 = vpop.eup %4342  ;;  %4002 = vmatprep.subr.bf16.mxu0 %v4225_v12 }
 0x35d   : > { %3993 = vmatmul.mubr.bf16.vlgmr.msra.gmra.mxu1 %v1871_v43  ;;  %v3299_v46 = vmul.f32 0.6931472, %v4343_v44 }
 0x35e   : > { %2565 = vmatprep.mubr.bf16.mxu1 %v4772_v38  ;;  %2534 = vmatpush1.bf16.msra.mxu1 %v4230_v17  ;;  %v4281_v17 = vld [vmem:[%s6087_s13 + $0x1a0] ss:$28 sps:$4 sm:$0xff]  }
 0x35f   : > { %v3306_v47 = vsub.f32 %v3290_v45, %v3299_v46  ;;  %4003 = vmatpush3.bf16.msra.mxu0 %v4225_v12  ;;  %v4274_v12 = vld [vmem:[%s6087_s13 + $0x4] ss:$28 sps:$4 sm:$0xff]  }
 0x360   : > { %v4345_v36 = vpop.eup %4344  ;;  %4004 = vmatprep.subr.bf16.mxu0 %v4226_v13 }
 0x361   : > { %v3795_v48 = vadd.f32 -1.0, %v3306_v47  ;;  %v3301_v50 = vmul.f32 0.6931472, %v4345_v36  ;;  %v4233_v47 = vld [vmem:[%s6087_s13 + $0x190] ss:$28 sps:$4 sm:$0xff]  }
 0x363   : > { %v3314_v54 = vsel %vm3285_vm9, %v3795_v48, 0.0  ;;  %v3307_v56 = vsub.f32 %v3291_v49, %v3301_v50  ;;  %4005 = vmatpush3.bf16.msra.mxu0 %v4226_v13  ;;  %v4238_v48 = vld [vmem:[%s6087_s13 + $0x154] ss:$28 sps:$4 sm:$0xff]   ;;  %v4241_v49 = vld [vmem:[%s6087_s13 + $0x15c] ss:$28 sps:$4 sm:$0xff]  }
 0x364   : > { %v4347_v57 = vpop.eup %4346  ;;  %3318 = vadd.xlane.f32.xlu0 %v3314_v54  ;;  %4006 = vmatprep.subr.bf16.mxu0 %v4227_v14  ;;  %v4236_v50 = vld [vmem:[%s6087_s13 + $0x150] ss:$28 sps:$4 sm:$0xff]   ;;  %v4244_v54 = vld [vmem:[%s6087_s13 + $0x11c] ss:$28 sps:$4 sm:$0xff]  }
 0x365   : > { %v3796_v59 = vadd.f32 -1.0, %v3307_v56  ;;  %v3303_v60 = vmul.f32 0.6931472, %v4347_v57  ;;  %2535 = vmatprep.subr.bf16.mxu1 %v4238_v48  ;;  %v4247_v56 = vld [vmem:[%s6087_s13 + $0x124] ss:$28 sps:$4 sm:$0xff]  }
 0x366   : > { %2536 = vmatpush1.bf16.msra.mxu1 %v4236_v50  ;;  %v4242_v57 = vld [vmem:[%s6087_s13 + $0x118] ss:$28 sps:$4 sm:$0xff]   ;;  %v4277_v13 = vld [vmem:[%s6087_s13 + $0xc] ss:$28 sps:$4 sm:$0xff]  }
 0x367   : > { %v3315_v62 = vsel %vm3285_vm9, %v3796_v59, 0.0  ;;  %v3308_v0 = vsub.f32 %v3292_v18, %v3303_v60  ;;  %4007 = vmatpush3.bf16.msra.mxu0 %v4227_v14  ;;  %v4245_v59 = vld [vmem:[%s6087_s13 + $0x120] ss:$28 sps:$4 sm:$0xff]   ;;  %2537 = vmatprep.subr.bf16.mxu1 %v4244_v54  ;;  %v4253_v60 = vld [vmem:[%s6087_s13 + $0xec] ss:$28 sps:$4 sm:$0xff]  }
 0x368   : > { %v4349_v1 = vpop.eup %4348  ;;  %3320 = vadd.xlane.f32.xlu0 %v3315_v62  ;;  %4008 = vmatprep.subr.bf16.mxu0 %v4228_v15  ;;  %v4250_v18 = vld [vmem:[%s6087_s13 + $0xe4] ss:$28 sps:$4 sm:$0xff]  }
 0x369   : > { %v3797_v2 = vadd.f32 -1.0, %v3308_v0  ;;  %v3305_v4 = vmul.f32 0.6931472, %v4349_v1  ;;  %v4251_v62 = vld [vmem:[%s6087_s13 + $0xe8] ss:$28 sps:$4 sm:$0xff]  }
 0x36a   : > { %2538 = vmatpush1.bf16.msra.mxu1 %v4242_v57  ;;  %v4256_v0 = vld [vmem:[%s6087_s13 + $0xac] ss:$28 sps:$4 sm:$0xff]   ;;  %v4259_v1 = vld [vmem:[%s6087_s13 + $0xb4] ss:$28 sps:$4 sm:$0xff]   ;;  %v4272_v14 = vld [vmem:[%s6087_s13] ss:$28 sps:$4 sm:$0xff]  }
 0x36b   : > { %v3316_v5 = vsel %vm3285_vm9, %v3797_v2, 0.0  ;;  %v3309_v6 = vsub.f32 %v3293_v3, %v3305_v4  ;;  %4009 = vmatpush3.bf16.msra.mxu0 %v4228_v15  ;;  %2539 = vmatprep.subr.bf16.mxu1 %v4250_v18  ;;  %v4254_v2 = vld [vmem:[%s6087_s13 + $0xa8] ss:$28 sps:$4 sm:$0xff]   ;;  %v4257_v3 = vld [vmem:[%s6087_s13 + $0xb0] ss:$28 sps:$4 sm:$0xff]  }
 0x36c   : > { %3322 = vadd.xlane.f32.xlu1 %v3316_v5  ;;  %4010 = vmatprep.subr.bf16.mxu0 %v4229_v16  ;;  %v4262_v4 = vld [vmem:[%s6087_s13 + $0x74] ss:$28 sps:$4 sm:$0xff]   ;;  %v4265_v5 = vld [vmem:[%s6087_s13 + $0x7c] ss:$28 sps:$4 sm:$0xff]   ;;  %v4275_v15 = vld [vmem:[%s6087_s13 + $0x8] ss:$28 sps:$4 sm:$0xff]  }
 0x36d   : > { %v3798_v7 = vadd.f32 -1.0, %v3309_v6  ;;  %v4260_v6 = vld [vmem:[%s6087_s13 + $0x70] ss:$28 sps:$4 sm:$0xff]   ;;  %v4285_v50 = vld [vmem:[%s6087_s13 + $0x168] ss:$28 sps:$4 sm:$0xff]  }
 0x36e   : > { %2540 = vmatpush1.bf16.msra.mxu1 %v4248_v61  ;;  %v4288_v57 = vld [vmem:[%s6087_s13 + $0x12c] ss:$28 sps:$4 sm:$0xff]  }
 0x36f   : > { %v3317_v8 = vsel %vm3285_vm9, %v3798_v7, 0.0  ;;  %4011 = vmatpush3.bf16.msra.mxu0 %v4229_v16  ;;  %2541 = vmatprep.subr.bf16.mxu1 %v4256_v0  ;;  %v4263_v7 = vld [vmem:[%s6087_s13 + $0x78] ss:$28 sps:$4 sm:$0xff]   ;;  %v4286_v61 = vld [vmem:[%s6087_s13 + $0x128] ss:$28 sps:$4 sm:$0xff]  }
 0x370   : > { %3324 = vadd.xlane.f32.xlu1 %v3317_v8  ;;  %2586 = vmatprep.subr.bf16.mxu0 %v4235_v22  ;;  %v4268_v8 = vld [vmem:[%s6087_s13 + $0x3c] ss:$28 sps:$4 sm:$0xff]   ;;  %v3710_v22 = vld [vmem:[%s6086_s12] ss:$0 sm:$0xff]  ;;  %v4292_v0 = vld [vmem:[%s6087_s13 + $0xf4] ss:$28 sps:$4 sm:$0xff]  }
 0x371   : > { %v4280_v16 = vld [vmem:[%s6087_s13 + $0x19c] ss:$28 sps:$4 sm:$0xff]  }
 0x372   : > { %2542 = vmatpush1.bf16.msra.mxu1 %v4254_v2  ;;  %v4290_v2 = vld [vmem:[%s6087_s13 + $0xf0] ss:$28 sps:$4 sm:$0xff]  }
 0x373   : > { %2543 = vmatprep.subr.bf16.mxu1 %v4262_v4  ;;  %v4297_v4 = vld [vmem:[%s6087_s13 + $0xc0] ss:$28 sps:$4 sm:$0xff]  }
 0x376   : > { %2544 = vmatpush1.bf16.msra.mxu1 %v4260_v6  ;;  %v4300_v6 = vld [vmem:[%s6087_s13 + $0x84] ss:$28 sps:$4 sm:$0xff]  }
 0x377   : > { %2545 = vmatprep.subr.bf16.mxu1 %v4268_v8  ;;  %v4298_v8 = vld [vmem:[%s6087_s13 + $0x80] ss:$28 sps:$4 sm:$0xff]  }
 0x37a   : > { %2546 = vmatpush1.bf16.msra.mxu1 %v4266_v10  ;;  %v4305_v10 = vld [vmem:[%s6087_s13 + $0x50] ss:$28 sps:$4 sm:$0xff]  }
 0x37b   : > { %2547 = vmatprep.subr.bf16.mxu1 %v4274_v12  ;;  %v4308_v12 = vld [vmem:[%s6087_s13 + $0x14] ss:$28 sps:$4 sm:$0xff]  }
 0x37e   : > { %2548 = vmatpush1.bf16.msra.mxu1 %v4272_v14  ;;  %v4306_v14 = vld [vmem:[%s6087_s13 + $0x10] ss:$28 sps:$4 sm:$0xff]  }
 0x37f   : > { %2639 = vmatprep.subr.bf16.mxu1 %v4280_v16  ;;  %v5413_v16 = vld [vmem:[%s6088_s14] sm:$0x7f] }
 0x3ed   : > { %v3319_v24 = vpop.xlane.xlu0 %3318 }
 0x3ee   : > { %v3326_v25 = vmul.f32 0.5, %v3319_v24 }
 0x3f0   : > { %3330 = vst.msk [vmem:[%s722_s20] sm:$0xff] %vm3274_vm10, %v3326_v25 }
 0x3f1   : > { %v3321_v27 = vpop.xlane.xlu0 %3320 }
 0x3f2   : > { %v3327_v23 = vmul.f32 0.5, %v3321_v27 }
 0x3f4   : > { %3331 = vst.msk [vmem:[%s722_s20 + $0x8] sm:$0xff] %vm3274_vm10, %v3327_v23 }
 0x3f5   : > { %v3323_v26 = vpop.xlane.xlu1 %3322 }
 0x3f6   : > { %v3328_v28 = vmul.f32 0.5, %v3323_v26 }
 0x3f8   : > { %3332 = vst.msk [vmem:[%s722_s20 + $0x10] sm:$0xff] %vm3274_vm10, %v3328_v28 }
 0x3f9   : > { %v3325_v29 = vpop.xlane.xlu1 %3324 }
 0x3fa   : > { %v3329_v30 = vmul.f32 0.5, %v3325_v29 }
 0x3fc   : > { %3333 = vst.msk [vmem:[%s722_s20 + $0x18] sm:$0xff] %vm3274_vm10, %v3329_v30  ;;  %s5989_s20 = scalar_lea.hbm %s6089_s15, %s4039_s26 }
 0x41d   : > { %v3994_v32 = vpop.f32.mrf.mxu1 }
 0x41e   : > { %v1986_v40 = vadd.f32 %v3994_v32, %v3701_v33 }
 0x41f   : > { %v1977_v34 = vpop.f32.mrf.mxu1 }
 0x420   : > { %v1978_v35 = vadd.f32 %v3701_v33, %v1977_v34 }
 0x421   : > { %v3995_v37 = vpop.f32.mrf.mxu1 }
 0x422   : > { %v1989_v39 = vadd.f32 %v3995_v37, %v3701_v33  ;;  %4350 = vtanh.f32 %v1978_v35 }
 0x423   : > { %v1980_v42 = vpop.f32.mrf.mxu1 }
 0x424   : > { %v1981_v43 = vadd.f32 %v3701_v33, %v1980_v42  ;;  %4352 = vtanh.f32 %v1989_v39 }
 0x426   : > { %4354 = vtanh.f32 %v1981_v43 }
 0x427   : > { %4356 = vtanh.f32 %v1986_v40 }
 0x42f   : > { %v4351_v44 = vpop.eup %4350 }
 0x431   : > { %v4353_v41 = vpop.eup %4352 }
 0x433   : > { %v4355_v45 = vpop.eup %4354 }
 0x434   : > { %v4357_v46 = vpop.eup %4356  ;;  %v1996_v31 = vpack.c.bf16 %v4355_v45, %v4351_v44 }
 0x435   : > { %v1997_v36 = vpack.c.bf16 %v4353_v41, %v4357_v46 }
 0x436   : > { %4012 = vmatprep.mubr.bf16.mxu0 %v1996_v31 }
 0x437   : > { %4013 = vmatmul.mubr.bf16.vlgmr.msra.gmra.mxu0 %v1997_v36 }
 0x438   : > { %2587 = vmatpush1.bf16.msra.mxu0 %v4233_v47  ;;  %2618 = vmatprep.mubr.bf16.mxu0 %v4772_v38  ;;  %v4278_v47 = vld [vmem:[%s6087_s13 + $0x198] ss:$28 sps:$4 sm:$0xff]  }
 0x439   : > { %2588 = vmatprep.subr.bf16.mxu0 %v4241_v49  ;;  %v4284_v49 = vld [vmem:[%s6087_s13 + $0x164] ss:$28 sps:$4 sm:$0xff]  }
 0x43c   : > { %2589 = vmatpush1.bf16.msra.mxu0 %v4239_v51 }
 0x43d   : > { %2590 = vmatprep.subr.bf16.mxu0 %v4247_v56  ;;  %v4282_v56 = vld [vmem:[%s6087_s13 + $0x160] ss:$28 sps:$4 sm:$0xff]  }
 0x440   : > { %2591 = vmatpush1.bf16.msra.mxu0 %v4245_v59  ;;  %v4289_v59 = vld [vmem:[%s6087_s13 + $0x130] ss:$28 sps:$4 sm:$0xff]  }
 0x441   : > { %2592 = vmatprep.subr.bf16.mxu0 %v4253_v60 }
 0x444   : > { %2593 = vmatpush1.bf16.msra.mxu0 %v4251_v62 }
 0x445   : > { %2594 = vmatprep.subr.bf16.mxu0 %v4259_v1  ;;  %v4293_v1 = vld [vmem:[%s6087_s13 + $0xf8] ss:$28 sps:$4 sm:$0xff]  }
 0x448   : > { %2595 = vmatpush1.bf16.msra.mxu0 %v4257_v3  ;;  %v4296_v3 = vld [vmem:[%s6087_s13 + $0xbc] ss:$28 sps:$4 sm:$0xff]  }
 0x449   : > { %2596 = vmatprep.subr.bf16.mxu0 %v4265_v5  ;;  %v4294_v5 = vld [vmem:[%s6087_s13 + $0xb8] ss:$28 sps:$4 sm:$0xff]  }
 0x44c   : > { %2597 = vmatpush1.bf16.msra.mxu0 %v4263_v7  ;;  %v4301_v7 = vld [vmem:[%s6087_s13 + $0x88] ss:$28 sps:$4 sm:$0xff]  }
 0x44d   : > { %2598 = vmatprep.subr.bf16.mxu0 %v4271_v9  ;;  %v4304_v9 = vld [vmem:[%s6087_s13 + $0x4c] ss:$28 sps:$4 sm:$0xff]  }
 0x450   : > { %2599 = vmatpush1.bf16.msra.mxu0 %v4269_v11  ;;  %v4302_v11 = vld [vmem:[%s6087_s13 + $0x48] ss:$28 sps:$4 sm:$0xff]  }
 0x451   : > { %2600 = vmatprep.subr.bf16.mxu0 %v4277_v13  ;;  %v4309_v13 = vld [vmem:[%s6087_s13 + $0x18] ss:$28 sps:$4 sm:$0xff]  }
 0x454   : > { %2601 = vmatpush1.bf16.msra.mxu0 %v4275_v15  ;;  %v2220_v15 = vsub.s32 2, %v5180_v19 }
 0x455   : > { %4016 = vmatprep.subr.bf16.mxu0 %v4281_v17 }
 0x4f7   : > { %v4014_v21 = vpop.f32.mrf.mxu0 }
 0x4f8   : > { %v2112_v28 = vadd.f32 %v4014_v21, %v3710_v22  ;;  %v5419_v21 = vrot.slane %v5413_v16, %v1681_v55 }
 0x4f9   : > { %v2103_v24 = vpop.f32.mrf.mxu0 }
 0x4fa   : > { %v2104_v25 = vadd.f32 %v3710_v22, %v2103_v24  ;;  %v2124_v34 = vmin.f32 %v2112_v28, 0.0  ;;  %vm2120_vm14 = vcmp.gt.f32.partialorder %v2112_v28, 0.0 }
 0x4fb   : > { %v4015_v27 = vpop.f32.mrf.mxu0 }
 0x4fc   : > { %v2122_v23 = vmin.f32 %v2104_v25, 0.0  ;;  %v2115_v26 = vadd.f32 %v4015_v27, %v3710_v22  ;;  %v2130_v40 = vmul.f32 1.442695, %v2124_v34  ;;  %vm2118_vm11 = vcmp.gt.f32.partialorder %v2104_v25, 0.0 }
 0x4fd   : > { %v2106_v29 = vpop.f32.mrf.mxu0 }
 0x4fe   : > { %v2126_v30 = vmul.f32 1.442695, %v2122_v23  ;;  %v2125_v32 = vmin.f32 %v2115_v26, 0.0  ;;  %v2107_v33 = vadd.f32 %v3710_v22, %v2106_v29  ;;  %vm2121_vm13 = vcmp.gt.f32.partialorder %v2115_v26, 0.0 }
 0x4ff   : > { %v5422_v22 = vrot.slane %v5413_v16, %v2220_v15 }
 0x500   : > { %4358 = vpow2.f32 %v2126_v30  ;;  %v2123_v35 = vmin.f32 %v2107_v33, 0.0  ;;  %v2132_v37 = vmul.f32 1.442695, %v2125_v32  ;;  %vm2119_vm12 = vcmp.gt.f32.partialorder %v2107_v33, 0.0 }
 0x502   : > { %v2128_v39 = vmul.f32 1.442695, %v2123_v35 }
 0x504   : > { %4360 = vpow2.f32 %v2128_v39 }
 0x505   : > { %4362 = vpow2.f32 %v2132_v37 }
 0x506   : > { %4364 = vpow2.f32 %v2130_v40 }
 0x50d   : > { %v4359_v42 = vpop.eup %4358 }
 0x50e   : > { %v3719_v43 = vadd.f32 -1.0, %v4359_v42 }
 0x510   : > { %v2138_v46 = vsel %vm2118_vm11, %v2104_v25, %v3719_v43  ;;  %v5427_v25 = vrot.slane %v5413_v16, %v1685_v20 }
 0x511   : > { %v4361_v44 = vpop.eup %4360 }
 0x512   : > { %v3720_v41 = vadd.f32 -1.0, %v4361_v44  ;;  %v4363_v45 = vpop.eup %4362 }
 0x513   : > { %v4365_v36 = vpop.eup %4364  ;;  %v3722_v51 = vadd.f32 -1.0, %v4363_v45 }
 0x514   : > { %v2139_v31 = vsel %vm2119_vm12, %v2107_v33, %v3720_v41  ;;  %v3721_v54 = vadd.f32 -1.0, %v4365_v36 }
 0x515   : > { %v5336_v48 = vpack.c.bf16 %v2139_v31, %v2138_v46  ;;  %v2141_v18 = vsel %vm2121_vm13, %v2115_v26, %v3722_v51 }
 0x516   : > { %v2140_v60 = vsel %vm2120_vm14, %v2112_v28, %v3721_v54 }
 0x517   : > { %2566 = vmatmul.mubr.bf16.vlgmr.msra.gmra.mxu1 %v5336_v48  ;;  %2619 = vmatmul.mubr.bf16.vlgmr.msra.gmra.mxu0 %v5336_v48  ;;  %v2143_v62 = vpack.c.bf16 %v2141_v18, %v2140_v60 }
 0x518   : > { %2640 = vmatpush1.bf16.msra.mxu1 %v4278_v47  ;;  %4017 = vmatpush3.bf16.msra.mxu0 %v4281_v17  ;;  %v2224_v17 = vsub.s32 3, %v5180_v19 }
 0x519   : > { %2641 = vmatprep.subr.bf16.mxu1 %v4284_v49  ;;  %4018 = vmatprep.subr.bf16.mxu0 %v4285_v50 }
 0x51a   : > { %2575 = vmatprep.mubr.bf16.mxu1 %v4772_v38  ;;  %2628 = vmatprep.mubr.bf16.mxu0 %v4772_v38  ;;  %v5430_v27 = vrot.slane %v5413_v16, %v2224_v17  ;;  %v5508_v17 = vld [vmem:[%s5027_s19 + $0x8] sm:$0xff] }
 0x51c   : > { %2642 = vmatpush1.bf16.msra.mxu1 %v4282_v56  ;;  %4019 = vmatpush3.bf16.msra.mxu0 %v4285_v50 }
 0x51d   : > { %2643 = vmatprep.subr.bf16.mxu1 %v4288_v57  ;;  %4020 = vmatprep.subr.bf16.mxu0 %v4289_v59 }
 0x51f   : > { %2576 = vmatmul.mubr.bf16.gmra.mxu1 %v2143_v62  ;;  %2629 = vmatmul.mubr.bf16.gmra.mxu0 %v2143_v62 }
 0x520   : > { %2644 = vmatpush1.bf16.msra.mxu1 %v4286_v61  ;;  %4021 = vmatpush3.bf16.msra.mxu0 %v4289_v59 }
 0x521   : > { %4032 = vmatprep.mubr.bf16.mxu0 %v5336_v48  ;;  %2645 = vmatprep.subr.bf16.mxu1 %v4292_v0 }
 0x522   : > { %4022 = vmatprep.subr.bf16.mxu0 %v4293_v1  ;;  %2671 = vmatprep.mubr.bf16.mxu1 %v4772_v38 }
 0x524   : > { %2646 = vmatpush1.bf16.msra.mxu1 %v4290_v2  ;;  %4023 = vmatpush3.bf16.msra.mxu0 %v4293_v1 }
 0x525   : > { %2647 = vmatprep.subr.bf16.mxu1 %v4296_v3  ;;  %4024 = vmatprep.subr.bf16.mxu0 %v4297_v4 }
 0x528   : > { %2648 = vmatpush1.bf16.msra.mxu1 %v4294_v5  ;;  %4025 = vmatpush3.bf16.msra.mxu0 %v4297_v4 }
 0x529   : > { %2649 = vmatprep.subr.bf16.mxu1 %v4300_v6  ;;  %4026 = vmatprep.subr.bf16.mxu0 %v4301_v7 }
 0x52c   : > { %2650 = vmatpush1.bf16.msra.mxu1 %v4298_v8  ;;  %4027 = vmatpush3.bf16.msra.mxu0 %v4301_v7 }
 0x52d   : > { %2651 = vmatprep.subr.bf16.mxu1 %v4304_v9  ;;  %4028 = vmatprep.subr.bf16.mxu0 %v4305_v10  ;;  %v4534_v9 = vld [vmem:[%s5027_s19] sm:$0xff] }
 0x530   : > { %2652 = vmatpush1.bf16.msra.mxu1 %v4302_v11  ;;  %4029 = vmatpush3.bf16.msra.mxu0 %v4305_v10  ;;  %v3154_v10 = vsub.f32 1.0, %v4534_v9  ;;  %v5504_v11 = vld [vmem:[%s5027_s19 + $0x10] sm:$0xff] }
 0x531   : > { %2653 = vmatprep.subr.bf16.mxu1 %v4308_v12  ;;  %4030 = vmatprep.subr.bf16.mxu0 %v4309_v13 }
 0x534   : > { %2654 = vmatpush1.bf16.msra.mxu1 %v4306_v14  ;;  %4031 = vmatpush3.bf16.msra.mxu0 %v4309_v13 }
 0x537   : > { %2672 = vmatmul.mubr.bf16.vlgmr.msra.gmra.mxu1 %v5336_v48  ;;  %4033 = vmatmul.mubr.bf16.vlgmr.msra.gmra.mxu0 %v2143_v62 }
 0x538   : > { %2681 = vmatprep.mubr.bf16.mxu1 %v4772_v38 }
 0x53f   : > { %2682 = vmatmul.mubr.bf16.gmra.mxu1 %v2143_v62 }
 0x5d7   : > { %v2567_v24 = vpop.f32.mrf.mxu1  ;;  %v2620_v38 = vpop.f32.mrf.mxu0 }
 0x5d8   : > { %v5433_v23 = vadd.f32 %v2567_v24, %v5419_v21  ;;  %v5436_v26 = vadd.f32 %v2620_v38, %v5422_v22  ;;  %v5512_v38 = vld [vmem:[%s5027_s19 + $0x18] sm:$0xff] }
 0x5d9   : > { %v2569_v55 = vpop.f32.mrf.mxu1  ;;  %v2622_v28 = vpop.f32.mrf.mxu0 }
 0x5da   : > { %v5439_v29 = vsub.f32 0.0, %v5433_v23  ;;  %v5442_v30 = vsub.f32 0.0, %v5436_v26  ;;  %v5445_v20 = vadd.f32 %v2569_v55, %v5427_v25  ;;  %v5448_v32 = vadd.f32 %v2622_v28, %v5430_v27 }
 0x5db   : > { %v2571_v33 = vpop.f32.mrf.mxu1  ;;  %v2624_v34 = vpop.f32.mrf.mxu0 }
 0x5dc   : > { %v2769_v35 = vmin.f32 %v5439_v29, 20.0  ;;  %v2771_v37 = vmin.f32 %v5442_v30, 20.0  ;;  %v5453_v39 = vsub.f32 0.0, %v5445_v20  ;;  %v5456_v40 = vsub.f32 0.0, %v5448_v32 }
 0x5dd   : > { %v2573_v42 = vpop.f32.mrf.mxu1  ;;  %v2626_v43 = vpop.f32.mrf.mxu0  ;;  %v5459_v45 = vadd.f32 %v2571_v33, %v5419_v21  ;;  %v5462_v46 = vadd.f32 %v2624_v34, %v5422_v22  ;;  %vm2853_vm15 = vcmp.gt.f32.partialorder %v5439_v29, 20.0  ;;  %vm2855_vm1 = vcmp.gt.f32.partialorder %v5442_v30, 20.0 }
 0x5de   : > { %v2797_v44 = vmul.f32 1.442695, %v2769_v35  ;;  %v2801_v41 = vmul.f32 1.442695, %v2771_v37  ;;  %v2770_v31 = vmin.f32 %v5453_v39, 20.0  ;;  %v2772_v47 = vmin.f32 %v5456_v40, 20.0 }
 0x5df   : > { %v5467_v36 = vsub.f32 0.0, %v5459_v45  ;;  %v5470_v48 = vsub.f32 0.0, %v5462_v46  ;;  %v2577_v49 = vpop.f32.mrf.mxu1  ;;  %v2630_v54 = vpop.f32.mrf.mxu0  ;;  %v5475_v59 = vadd.f32 %v2573_v42, %v5427_v25  ;;  %v5478_v18 = vadd.f32 %v2626_v43, %v5430_v27  ;;  %v5516_v35 = vld [vmem:[%s5027_s19 + $0x38] sm:$0xff]  ;;  %v5520_v42 = vld [vmem:[%s5027_s19 + $0x48] sm:$0xff] }
 0x5e0   : > { %4366 = vpow2.f32 %v2797_v44  ;;  %v2799_v50 = vmul.f32 1.442695, %v2770_v31  ;;  %v2803_v51 = vmul.f32 1.442695, %v2772_v47  ;;  %v5481_v60 = vadd.f32 %v2577_v49, %v5419_v21  ;;  %v5524_v44 = vld [vmem:[%s5027_s19 + $0x40] sm:$0xff]  ;;  %v5528_v31 = vld [vmem:[%s5027_s19 + $0x50] sm:$0xff] }
 0x5e1   : > { %4368 = vpow2.f32 %v2801_v41  ;;  %v2776_v56 = vmin.f32 %v5467_v36, 20.0  ;;  %v2778_v57 = vmin.f32 %v5470_v48, 20.0  ;;  %v5484_v0 = vadd.f32 %v2630_v54, %v5422_v22  ;;  %v2579_v15 = vpop.f32.mrf.mxu1  ;;  %v2632_v34 = vpop.f32.mrf.mxu0  ;;  %v5532_v49 = vld [vmem:[%s5027_s19 + $0x70] sm:$0xff]  ;;  %v5555_v41 = vld [vmem:[%s5027_s19 + $0xb8] sm:$0xff] }
 0x5e2   : > { %4370 = vpow2.f32 %v2799_v50  ;;  %v5487_v1 = vsub.f32 0.0, %v5475_v59  ;;  %v5490_v2 = vsub.f32 0.0, %v5478_v18  ;;  %v5493_v3 = vsub.f32 0.0, %v5481_v60  ;;  %v5551_v50 = vld [vmem:[%s5027_s19 + $0xa8] sm:$0xff] }
 0x5e3   : > { %4372 = vpow2.f32 %v2803_v51  ;;  %v2811_v61 = vmul.f32 1.442695, %v2776_v56  ;;  %v2815_v62 = vmul.f32 1.442695, %v2778_v57  ;;  %v5496_v4 = vsub.f32 0.0, %v5484_v0  ;;  %v5537_v56 = vld [vmem:[%s5027_s19 + $0x80] sm:$0xff] }
 0x5e4   : > { %v2777_v5 = vmin.f32 %v5487_v1, 20.0  ;;  %v2779_v6 = vmin.f32 %v5490_v2, 20.0  ;;  %v2783_v7 = vmin.f32 %v5493_v3, 20.0  ;;  %v2228_v51 = vsub.s32 4, %v5180_v19 }
 0x5e5   : > { %4374 = vpow2.f32 %v2811_v61  ;;  %v2785_v8 = vmin.f32 %v5496_v4, 20.0  ;;  %v2581_v61 = vpop.f32.mrf.mxu1  ;;  %v5563_v9 = vadd.f32 %v2579_v15, %v5427_v25  ;;  %v5579_v15 = vmul.f32 %v3154_v10, %v5433_v23 }
 0x5e6   : > { %4376 = vpow2.f32 %v2815_v62  ;;  %v2813_v13 = vmul.f32 1.442695, %v2777_v5  ;;  %v2817_v14 = vmul.f32 1.442695, %v2779_v6  ;;  %v2825_v28 = vmul.f32 1.442695, %v2783_v7 }
 0x5e7   : > { %v2829_v33 = vmul.f32 1.442695, %v2785_v8  ;;  %v2236_v62 = vsub.s32 6, %v5180_v19  ;;  %v2232_v5 = vsub.s32 5, %v5180_v19  ;;  %v5543_v8 = vld [vmem:[%s5027_s19 + $0x78] sm:$0xff]  ;;  %v5570_v37 = vrot.slane %v5413_v16, %v2228_v51  ;;  %v2583_v19 = vpop.f32.mrf.mxu1 }
 0x5e8   : > { %4378 = vpow2.f32 %v2813_v13  ;;  %v5547_v13 = vld [vmem:[%s5027_s19 + $0x88] sm:$0xff]  ;;  %vm2854_vm2 = vcmp.gt.f32.partialorder %v5453_v39, 20.0  ;;  %vm2856_vm3 = vcmp.gt.f32.partialorder %v5456_v40, 20.0  ;;  %vm2860_vm4 = vcmp.gt.f32.partialorder %v5467_v36, 20.0 }
 0x5e9   : > { %4380 = vpow2.f32 %v2817_v14  ;;  %v5566_v14 = vld [vmem:[%s5027_s19 + $0xc0] sm:$0xff]  ;;  %v5573_v24 = vrot.slane %v5413_v16, %v2236_v62  ;;  %v5590_v62 = vadd.f32 %v2581_v61, %v5419_v21  ;;  %v6147_v21 = vsub.f32 1.0, %v5512_v38 }
 0x5ea   : > { %4382 = vpow2.f32 %v2825_v28  ;;  %v2634_v28 = vpop.f32.mrf.mxu0  ;;  %6144 = vst [vmem:[#allocation26_spill] sm:$0xff] %v5566_v14  ;;  %vm2862_vm5 = vcmp.gt.f32.partialorder %v5470_v48, 20.0  ;;  %vm2861_vm6 = vcmp.gt.f32.partialorder %v5487_v1, 20.0  ;;  %vm2863_vm7 = vcmp.gt.f32.partialorder %v5490_v2, 20.0 }
 0x5eb   : > { %4384 = vpow2.f32 %v2829_v33  ;;  %v5559_v33 = vld [vmem:[%s5027_s19 + $0xb0] sm:$0xff]  ;;  %vm2867_vm8 = vcmp.gt.f32.partialorder %v5493_v3, 20.0  ;;  %vm2869_vm9 = vcmp.gt.f32.partialorder %v5496_v4, 20.0 }
 0x5ec   : > { %v2636_v51 = vpop.f32.mrf.mxu0 }
 0x5ed   : > { %v4367_v54 = vpop.eup %4366 }
 0x5ee   : > { %v4369_v6 = vpop.eup %4368  ;;  %v2881_v7 = vadd.f32 1.0, %v4367_v54  ;;  %v5576_v54 = vrot.slane %v5413_v16, %v2232_v5  ;;  %v5593_v16 = vadd.f32 %v2634_v28, %v5422_v22  ;;  %v5609_v22 = vmul.f32 %v6147_v21, %v5448_v32 }
 0x5ef   : > { %v2883_v57 = vadd.f32 1.0, %v4369_v6  ;;  %v4371_v43 = vpop.eup %4370  ;;  %v5582_v6 = vadd.f32 %v2632_v34, %v5430_v27  ;;  %v5596_v34 = vsub.f32 0.0, %v5563_v9 }
 0x5f0   : > { %4386 = vlog2.f32 %v2881_v7  ;;  %v4373_v47 = vpop.eup %4372  ;;  %v2882_v55 = vadd.f32 1.0, %v4371_v43  ;;  %v6145_v43 = vsub.f32 1.0, %v5504_v11 }
 0x5f1   : > { %4388 = vrcp.f32 %v2881_v7  ;;  %v2884_v12 = vadd.f32 1.0, %v4373_v47  ;;  %v5599_v47 = vadd.f32 %v2583_v19, %v5427_v25  ;;  %v5620_v61 = vsub.f32 0.0, %v5582_v6 }
 0x5f2   : > { %4390 = vlog2.f32 %v2883_v57  ;;  %v4375_v53 = vpop.eup %4374  ;;  %v5587_v7 = vmul.f32 %v6145_v43, %v5436_v26  ;;  %v6146_v26 = vsub.f32 1.0, %v5508_v17  ;;  %v5632_v17 = vsub.f32 0.0, %v5593_v16 }
 0x5f3   : > { %4392 = vrcp.f32 %v2883_v57  ;;  %v4377_v23 = vpop.eup %4376  ;;  %v2888_v10 = vadd.f32 1.0, %v4375_v53  ;;  %v5612_v57 = vadd.f32 %v2636_v51, %v5430_v27  ;;  %v6149_v53 = vsub.f32 1.0, %v5516_v35  ;;  %6150 = vst [vmem:[#allocation28_spill] sm:$0xff] %v5620_v61 }
 0x5f4   : > { %4394 = vlog2.f32 %v2882_v55  ;;  %v5604_v11 = vmul.f32 %v6146_v26, %v5445_v20  ;;  %v6151_v20 = vsub.f32 1.0, %v5520_v42  ;;  %v5629_v27 = vsub.f32 0.0, %v5590_v62  ;;  %6153 = vst [vmem:[#allocation30_spill] sm:$0xff] %v5632_v17 }
 0x5f5   : > { %4396 = vrcp.f32 %v2882_v55  ;;  %6148 = vst [vmem:[#allocation27_spill] sm:$0xff] %v5612_v57  ;;  %v5617_v25 = vmul.f32 %v6149_v53, %v5459_v45  ;;  %v2890_v55 = vadd.f32 1.0, %v4377_v23  ;;  %v4379_v38 = vpop.eup %4378  ;;  %v6154_v35 = vsub.f32 1.0, %v5524_v44 }
 0x5f6   : > { %4398 = vlog2.f32 %v2884_v12  ;;  %v5626_v32 = vmul.f32 %v6151_v20, %v5462_v46  ;;  %6152 = vst [vmem:[#allocation29_spill] sm:$0xff] %v5629_v27  ;;  %v5641_v42 = vsub.f32 0.0, %v5599_v47  ;;  %v4381_v28 = vpop.eup %4380  ;;  %v2889_v19 = vadd.f32 1.0, %v4379_v38 }
 0x5f7   : > { %4400 = vrcp.f32 %v2884_v12  ;;  %v2673_v45 = vpop.f32.mrf.mxu1  ;;  %v5637_v5 = vmul.f32 %v6154_v35, %v5475_v59  ;;  %v2784_v12 = vmin.f32 %v5596_v34, 20.0  ;;  %v4034_v46 = vpop.f32.mrf.mxu0  ;;  %v5645_v51 = vsub.f32 0.0, %v5612_v57 }
 0x5f8   : > { %4402 = vlog2.f32 %v2888_v10  ;;  %6155 = vst [vmem:[#allocation31_spill] sm:$0xff] %v5641_v42  ;;  %v5648_v43 = vadd.f32 %v2673_v45, %v5570_v37  ;;  %v4383_v44 = vpop.eup %4382  ;;  %v2891_v59 = vadd.f32 1.0, %v4381_v28  ;;  %v6158_v23 = vsub.f32 1.0, %v5528_v31 }
 0x5f9   : > { %4404 = vrcp.f32 %v2888_v10  ;;  %6156 = vst [vmem:[#allocation32_spill] sm:$0xff] %v5645_v51  ;;  %v2786_v21 = vmin.f32 %v5620_v61, 20.0  ;;  %v4385_v53 = vpop.eup %4384  ;;  %v2790_v10 = vmin.f32 %v5629_v27, 20.0  ;;  %v2792_v20 = vmin.f32 %v5632_v17, 20.0  ;;  %v2675_v63 = vpop.f32.mrf.mxu1 }
 0x5fa   : > { %6157 = vst [vmem:[#allocation33_spill] sm:$0xff] %v5648_v43  ;;  %4406 = vlog2.f32 %v2890_v55  ;;  %v5653_v26 = vmul.f32 %v6158_v23, %v5478_v18  ;;  %v5660_v45 = vadd.f32 %v4034_v46, %v5573_v24  ;;  %v5662_v38 = vadd.f32 1.0, %v4383_v44 }
 0x5fb   : > { %4408 = vrcp.f32 %v2890_v55  ;;  %v6160_v18 = vsub.f32 1.0, %v5532_v49  ;;  %v2827_v35 = vmul.f32 1.442695, %v2784_v12  ;;  %v2791_v55 = vmin.f32 %v5641_v42, 20.0 }
 0x5fc   : > { %6159 = vst [vmem:[#allocation34_spill] sm:$0xff] %v5660_v45  ;;  %4410 = vlog2.f32 %v2889_v19  ;;  %v2793_v23 = vmin.f32 %v5645_v51, 20.0  ;;  %v5673_v46 = vsub.f32 0.0, %v5648_v43  ;;  %v5676_v49 = vadd.f32 1.0, %v4385_v53  ;;  %v2726_v51 = vpop.f32.mrf.mxu0 }
 0x5fd   : > { %v5667_v31 = vmul.f32 %v6160_v18, %v5481_v60  ;;  %v4387_v28 = vpop.eup %4386  ;;  %4412 = vrcp.f32 %v2889_v19  ;;  %v2831_v60 = vmul.f32 1.442695, %v2786_v21  ;;  %v2839_v19 = vmul.f32 1.442695, %v2790_v10 }
 0x5fe   : > { %6161 = vst [vmem:[#allocation35_spill] sm:$0xff] %v5673_v46  ;;  %v4389_v44 = vpop.eup %4388  ;;  %v2910_v17 = vmul.f32 0.6931472, %v4387_v28  ;;  %4414 = vlog2.f32 %v2891_v59  ;;  %v2843_v18 = vmul.f32 1.442695, %v2792_v20  ;;  %v5680_v42 = vsub.f32 0.0, %v5660_v45 }
 0x5ff   : > { %v4391_v12 = vpop.eup %4390  ;;  %4416 = vrcp.f32 %v2891_v59  ;;  %v5687_v21 = vadd.f32 %v2675_v63, %v5576_v54  ;;  %v2841_v59 = vmul.f32 1.442695, %v2791_v55  ;;  %v2845_v10 = vmul.f32 1.442695, %v2793_v23 }
 0x600   : > { %v4393_v43 = vpop.eup %4392  ;;  %v2965_v28 = vsel %vm2853_vm15, %v5439_v29, %v2910_v17  ;;  %v2914_v27 = vmul.f32 0.6931472, %v4391_v12  ;;  %4418 = vlog2.f32 %v5662_v38  ;;  %v2773_v20 = vmin.f32 %v5673_v46, 20.0 }
 0x601   : > { %v4395_v53 = vpop.eup %4394  ;;  %v3126_v14 = vsub.f32 0.0, %v2965_v28  ;;  %4420 = vlog2.f32 %v5676_v49  ;;  %v5696_v63 = vadd.f32 %v2726_v51, %v5573_v24  ;;  %v2789_v23 = vmin.f32 %v5680_v42, 20.0 }
 0x602   : > { %v4397_v45 = vpop.eup %4396  ;;  %v2967_v57 = vsel %vm2855_vm1, %v5442_v30, %v2914_v27  ;;  %v2912_v29 = vmul.f32 0.6931472, %v4395_v53  ;;  %4422 = vpow2.f32 %v2827_v35  ;;  %v5705_v53 = vsub.f32 0.0, %v5687_v21 }
 0x603   : > { %v4399_v17 = vpop.eup %4398  ;;  %v3210_v12 = vsub.f32 %v3126_v14, %v5579_v15  ;;  %v3128_v28 = vsub.f32 0.0, %v2967_v57  ;;  %v3807_v55 = vpack.c.bf16 %v4397_v45, %v4389_v44  ;;  %4424 = vpow2.f32 %v2831_v60 }
 0x604   : > { %v4401_v46 = vpop.eup %4400  ;;  %v2966_v30 = vsel %vm2854_vm2, %v5453_v39, %v2912_v29  ;;  %v2916_v27 = vmul.f32 0.6931472, %v4399_v17  ;;  %4426 = vpow2.f32 %v2839_v19  ;;  %vm2868_vm11 = vcmp.gt.f32.partialorder %v5596_v34, 20.0 }
 0x605   : > { %v4403_v51 = vpop.eup %4402  ;;  %v3212_v61 = vsub.f32 %v3128_v28, %v5587_v7  ;;  %3109 = vst [vmem:[%s5710_s30] sm:$0xff] %v3807_v55  ;;  %v3127_v14 = vsub.f32 0.0, %v2966_v30  ;;  %v3808_v15 = vpack.c.bf16 %v4401_v46, %v4393_v43  ;;  %v5718_v7 = vsub.f32 0.0, %v5696_v63 }
 0x606   : > { %v4405_v39 = vpop.eup %4404  ;;  %v2968_v57 = vsel %vm2856_vm3, %v5456_v40, %v2916_v27  ;;  %v2924_v45 = vmul.f32 0.6931472, %v4403_v51  ;;  %4428 = vpow2.f32 %v2843_v18  ;;  %v2805_v43 = vmul.f32 1.442695, %v2773_v20 }
 0x607   : > { %v4407_v35 = vpop.eup %4406  ;;  %v3211_v44 = vsub.f32 %v3127_v14, %v5604_v11  ;;  %3110 = vst [vmem:[%s5710_s30 + $0x8] sm:$0xff] %v3808_v15  ;;  %v3129_v29 = vsub.f32 0.0, %v2968_v57  ;;  %4430 = vpow2.f32 %v2841_v59  ;;  %v2774_v40 = vmin.f32 %v5705_v53, 20.0  ;;  %v2677_v57 = vpop.f32.mrf.mxu1 }
 0x608   : > { %v4409_v46 = vpop.eup %4408  ;;  %v2972_v60 = vsel %vm2860_vm4, %v5467_v36, %v2924_v45  ;;  %v2928_v17 = vmul.f32 0.6931472, %v4407_v35  ;;  %v2837_v27 = vmul.f32 1.442695, %v2789_v23  ;;  %4432 = vpow2.f32 %v2845_v10 }
 0x609   : > { %v4411_v19 = vpop.eup %4410  ;;  %v3238_v28 = vadd.f32 %v3211_v44, %v3210_v12  ;;  %v3213_v55 = vsub.f32 %v3129_v29, %v5609_v22  ;;  %v3133_v30 = vsub.f32 0.0, %v2972_v60  ;;  %v2775_v36 = vmin.f32 %v5718_v7, 20.0 }
 0x60a   : > { %v4413_v11 = vpop.eup %4412  ;;  %v2974_v18 = vsel %vm2862_vm5, %v5470_v48, %v2928_v17  ;;  %v2926_v20 = vmul.f32 0.6931472, %v4411_v19  ;;  %4434 = vpow2.f32 %v2805_v43  ;;  %v2807_v48 = vmul.f32 1.442695, %v2774_v40 }
 0x60b   : > { %v4415_v51 = vpop.eup %4414  ;;  %v3239_v59 = vadd.f32 %v3238_v28, %v3212_v61  ;;  %v3217_v14 = vsub.f32 %v3133_v30, %v5617_v25  ;;  %v3135_v15 = vsub.f32 0.0, %v2974_v18  ;;  %v3811_v12 = vpack.c.bf16 %v4413_v11, %v4405_v39 }
 0x60c   : > { %v4417_v22 = vpop.eup %4416  ;;  %v2973_v23 = vsel %vm2861_vm6, %v5487_v1, %v2926_v20  ;;  %v2930_v45 = vmul.f32 0.6931472, %v4415_v51  ;;  %4436 = vpow2.f32 %v2837_v27  ;;  %v2809_v60 = vmul.f32 1.442695, %v2775_v36 }
 0x60d   : > { %v4419_v10 = vpop.eup %4418  ;;  %v5735_v35 = vadd.f32 %v3239_v59, %v3213_v55  ;;  %v3219_v44 = vsub.f32 %v3135_v15, %v5626_v32  ;;  %3114 = vst [vmem:[%s5710_s30 + $0x1c] sm:$0xff] %v3811_v12  ;;  %v3134_v61 = vsub.f32 0.0, %v2973_v23  ;;  %v3812_v25 = vpack.c.bf16 %v4417_v22, %v4409_v46  ;;  %v2679_v32 = vpop.f32.mrf.mxu1 }
 0x60e   : > { %v2975_v39 = vsel %vm2863_vm7, %v5490_v2, %v2930_v45  ;;  %v2938_v29 = vmul.f32 0.6931472, %v4419_v10  ;;  %v4421_v1 = vpop.eup %4420  ;;  %4438 = vrcp.f32 %v5662_v38  ;;  %v6162_v38 = vsub.f32 1.0, %v5537_v56  ;;  %v4550_v45 = vld [vmem:[%s5027_s19 + $0x20] sm:$0xff] }
 0x60f   : > { %v3218_v17 = vsub.f32 %v3134_v61, %v5637_v5  ;;  %3115 = vst [vmem:[%s5710_s30 + $0x24] sm:$0xff] %v3812_v25  ;;  %v3136_v43 = vsub.f32 0.0, %v2975_v39  ;;  %v2942_v46 = vmul.f32 0.6931472, %v4421_v1  ;;  %4440 = vpow2.f32 %v2807_v48  ;;  %v4423_v2 = vpop.eup %4422  ;;  %v4035_v5 = vpop.f32.mrf.mxu0  ;;  %v5778_v25 = vld [vmem:[%s5027_s19 + $0x28] sm:$0xff] }
 0x610   : > { %v2979_v40 = vsel %vm2867_vm8, %v5493_v3, %v2938_v29  ;;  %4442 = vrcp.f32 %v5676_v49  ;;  %v4425_v30 = vpop.eup %4424  ;;  %v3198_v11 = vmul.f32 %v6162_v38, %v5484_v0  ;;  %v2896_v3 = vadd.f32 1.0, %v4423_v2  ;;  %v2683_v59 = vpop.f32.mrf.mxu1 }
 0x611   : > { %v3247_v19 = vadd.f32 %v3218_v17, %v3217_v14  ;;  %v3220_v28 = vsub.f32 %v3136_v43, %v5653_v26  ;;  %v3140_v55 = vsub.f32 0.0, %v2979_v40  ;;  %v2981_v27 = vsel %vm2869_vm9, %v5496_v4, %v2942_v46  ;;  %v4427_v18 = vpop.eup %4426  ;;  %v2729_v22 = vpop.f32.mrf.mxu0 }
 0x612   : > { %4444 = vpow2.f32 %v2809_v60  ;;  %v3142_v51 = vsub.f32 0.0, %v2981_v27  ;;  %v2898_v26 = vadd.f32 1.0, %v4425_v30  ;;  %v2902_v14 = vadd.f32 1.0, %v4427_v18  ;;  %v2685_v60 = vpop.f32.mrf.mxu1  ;;  %v6168_v18 = vld [vmem:[#allocation28_spill] sm:$0xff] }
 0x613   : > { %v3248_v20 = vadd.f32 %v3247_v19, %v3219_v44  ;;  %v5755_v36 = vsub.f32 %v3140_v55, %v5667_v31  ;;  %v4429_v49 = vpop.eup %4428  ;;  %4446 = vlog2.f32 %v2896_v3  ;;  %v5758_v4 = vadd.f32 %v2677_v57, %v5570_v37 }
 0x614   : > { %v5761_v0 = vadd.f32 %v4035_v5, %v5573_v24  ;;  %v4431_v56 = vpop.eup %4430  ;;  %v5765_v12 = vsub.f32 %v3142_v51, %v3198_v11  ;;  %4448 = vrcp.f32 %v2896_v3  ;;  %v5768_v31 = vadd.f32 %v2679_v32, %v5576_v54 }
 0x615   : > { %v5763_v15 = vadd.f32 %v3248_v20, %v3220_v28  ;;  %4450 = vlog2.f32 %v2898_v26  ;;  %v2904_v23 = vadd.f32 1.0, %v4429_v49  ;;  %v3158_v48 = vsub.f32 1.0, %v4550_v45  ;;  %v4433_v10 = vpop.eup %4432 }
 0x616   : > { %v3174_v57 = vsub.f32 1.0, %v5096_v58  ;;  %v6163_v44 = vsub.f32 1.0, %v5543_v8  ;;  %4452 = vrcp.f32 %v2898_v26  ;;  %v3159_v39 = vsub.f32 1.0, %v5778_v25  ;;  %v6169_v26 = vld [vmem:[#allocation27_spill] sm:$0xff] }
 0x617   : > { %4454 = vlog2.f32 %v2902_v14  ;;  %v2903_v1 = vadd.f32 1.0, %v4431_v56  ;;  %v5783_v17 = vsub.f32 0.0, %v5758_v4  ;;  %v5786_v43 = vadd.f32 %v2729_v22, %v5573_v24  ;;  %v4435_v32 = vpop.eup %4434  ;;  %v6172_v22 = vld [vmem:[#allocation29_spill] sm:$0xff] }
 0x618   : > { %v5775_v61 = vmul.f32 %v6163_v44, %v5563_v9  ;;  %4456 = vrcp.f32 %v2902_v14  ;;  %v5789_v8 = vsub.f32 0.0, %v5761_v0  ;;  %v5792_v9 = vsub.f32 0.0, %v5768_v31 }
 0x619   : > { %v5795_v40 = vadd.f32 %v2683_v59, %v5570_v37  ;;  %v6164_v46 = vsub.f32 1.0, %v5547_v13  ;;  %v6165_v24 = vsub.f32 1.0, %v5551_v50  ;;  %4458 = vlog2.f32 %v2904_v23  ;;  %v4437_v55 = vpop.eup %4436 }
 0x61a   : > { %v2905_v28 = vadd.f32 1.0, %v4433_v10  ;;  %4460 = vrcp.f32 %v2904_v23  ;;  %v6166_v5 = vsub.f32 1.0, %v5555_v41  ;;  %v5814_v13 = vsub.f32 0.0, %v5786_v43  ;;  %v6173_v23 = vld [vmem:[#allocation33_spill] sm:$0xff] }
 0x61b   : > { %v5800_v2 = vmul.f32 %v6164_v46, %v5582_v6  ;;  %v5805_v19 = vmul.f32 %v6165_v24, %v5590_v62  ;;  %v2687_v6 = vpop.f32.mrf.mxu1  ;;  %v4439_v27 = vpop.eup %4438  ;;  %4462 = vlog2.f32 %v2903_v1  ;;  %v6167_v50 = vsub.f32 1.0, %v5559_v33  ;;  %v6170_v33 = vld [vmem:[#allocation26_spill] sm:$0xff] }
 0x61c   : > { %v5811_v30 = vmul.f32 %v6166_v5, %v5593_v16  ;;  %v2885_v38 = vadd.f32 1.0, %v4435_v32  ;;  %v2780_v11 = vmin.f32 %v5783_v17, 20.0  ;;  %v4441_v3 = vpop.eup %4440  ;;  %vm2870_vm12 = vcmp.gt.f32.partialorder %v6168_v18, 20.0 }
 0x61d   : > { %v5819_v62 = vmul.f32 %v6167_v50, %v5599_v47  ;;  %4464 = vrcp.f32 %v2903_v1  ;;  %v2796_v41 = vmin.f32 %v5789_v8, 20.0  ;;  %v2781_v16 = vmin.f32 %v5792_v9, 20.0  ;;  %v4443_v51 = vpop.eup %4442  ;;  %v2689_v1 = vpop.f32.mrf.mxu1 }
 0x61e   : > { %v5826_v20 = vsub.f32 0.0, %v5795_v40  ;;  %4466 = vlog2.f32 %v2905_v28  ;;  %v6171_v47 = vsub.f32 1.0, %v6170_v33  ;;  %v2901_v49 = vadd.f32 1.0, %v4437_v55  ;;  %v6174_v55 = vld [vmem:[#allocation30_spill] sm:$0xff]  ;;  %v6175_v33 = vld [vmem:[#allocation31_spill] sm:$0xff] }
 0x61f   : > { %v5834_v14 = vadd.f32 %v2685_v60, %v5576_v54  ;;  %v4445_v56 = vpop.eup %4444  ;;  %vm2874_vm13 = vcmp.gt.f32.partialorder %v6172_v22, 20.0  ;;  %4468 = vrcp.f32 %v2905_v28  ;;  %v5838_v45 = vmul.f32 %v3158_v48, %v6173_v23 }
 0x620   : > { %v5831_v59 = vmul.f32 %v6171_v47, %v6169_v26  ;;  %v2782_v10 = vmin.f32 %v5814_v13, 20.0  ;;  %v5842_v44 = vadd.f32 %v2687_v6, %v5570_v37  ;;  %4470 = vlog2.f32 %v2885_v38  ;;  %v4447_v60 = vpop.eup %4446 }
 0x621   : > { %v2886_v32 = vadd.f32 1.0, %v4441_v3  ;;  %v2819_v46 = vmul.f32 1.442695, %v2780_v11  ;;  %v5845_v24 = vsub.f32 0.0, %v5834_v14  ;;  %vm2876_vm14 = vcmp.gt.f32.partialorder %v6174_v55, 20.0  ;;  %v4449_v50 = vpop.eup %4448 }
 0x622   : > { %4472 = vrcp.f32 %v2885_v38  ;;  %v2851_v28 = vmul.f32 1.442695, %v2796_v41  ;;  %v2821_v5 = vmul.f32 1.442695, %v2781_v16  ;;  %v2787_v48 = vmin.f32 %v5826_v20, 20.0  ;;  %v4451_v11 = vpop.eup %4450 }
 0x623   : > { %v2940_v26 = vmul.f32 0.6931472, %v4447_v60  ;;  %4474 = vlog2.f32 %v2901_v49  ;;  %v2887_v37 = vadd.f32 1.0, %v4445_v56  ;;  %v5850_v6 = vadd.f32 %v2689_v1, %v5576_v54  ;;  %v4453_v41 = vpop.eup %4452  ;;  %v6176_v60 = vld [vmem:[#allocation32_spill] sm:$0xff] }
 0x624   : > { %v3815_v3 = vpack.c.bf16 %v4449_v50, %v4439_v27  ;;  %vm2875_vm15 = vcmp.gt.f32.partialorder %v6175_v33, 20.0  ;;  %4476 = vrcp.f32 %v2901_v49  ;;  %v2823_v47 = vmul.f32 1.442695, %v2782_v10  ;;  %v4455_v56 = vpop.eup %4454 }
 0x625   : > { %v5854_v38 = vsub.f32 0.0, %v5842_v44  ;;  %v2980_v16 = vsel %vm2868_vm11, %v5596_v34, %v2940_v26  ;;  %v2944_v23 = vmul.f32 0.6931472, %v4451_v11  ;;  %4478 = vlog2.f32 %v2886_v32  ;;  %v4457_v10 = vpop.eup %4456 }
 0x626   : > { %v2788_v54 = vmin.f32 %v5845_v24, 20.0  ;;  %3118 = vst [vmem:[%s5710_s30 + $0x38] sm:$0xff] %v3815_v3  ;;  %v3141_v27 = vsub.f32 0.0, %v2980_v16  ;;  %v3816_v1 = vpack.c.bf16 %v4453_v41, %v4443_v51  ;;  %vm2877_vm1 = vcmp.gt.f32.partialorder %v6176_v60, 20.0  ;;  %v4459_v26 = vpop.eup %4458  ;;  %v6177_v51 = vld [vmem:[#allocation35_spill] sm:$0xff] }
 0x627   : > { %4480 = vrcp.f32 %v2886_v32  ;;  %v2833_v49 = vmul.f32 1.442695, %v2787_v48  ;;  %v2982_v50 = vsel %vm2870_vm12, %v6168_v18, %v2944_v23  ;;  %v2952_v29 = vmul.f32 0.6931472, %v4455_v56  ;;  %v4461_v48 = vpop.eup %4460 }
 0x628   : > { %4482 = vlog2.f32 %v2887_v37  ;;  %v5866_v34 = vsub.f32 0.0, %v5850_v6  ;;  %v3225_v11 = vsub.f32 %v3141_v27, %v5775_v61  ;;  %3119 = vst [vmem:[%s5710_s30 + $0x40] sm:$0xff] %v3816_v1  ;;  %v3143_v3 = vsub.f32 0.0, %v2982_v50  ;;  %v4463_v23 = vpop.eup %4462 }
 0x629   : > { %vm2857_vm2 = vcmp.gt.f32.partialorder %v6177_v51, 20.0  ;;  %4484 = vrcp.f32 %v2887_v37  ;;  %v2794_v32 = vmin.f32 %v5854_v38, 20.0  ;;  %v2986_v18 = vsel %vm2874_vm13, %v6172_v22, %v2952_v29 }
 0x62a   : > { %v2956_v41 = vmul.f32 0.6931472, %v4459_v26  ;;  %vm3112_vm3 = vcmask 125952   ;;  %4486 = vpow2.f32 %v2819_v46  ;;  %v2835_v16 = vmul.f32 1.442695, %v2788_v54  ;;  %v4465_v1 = vpop.eup %4464 }
 0x62b   : > { %v3256_v56 = vadd.f32 %v3225_v11, %v5755_v36  ;;  %v3227_v61 = vsub.f32 %v3143_v3, %v5800_v2  ;;  %v3147_v27 = vsub.f32 0.0, %v2986_v18  ;;  %4488 = vpow2.f32 %v2851_v28  ;;  %v4467_v22 = vpop.eup %4466 }
 0x62c   : > { %v2988_v37 = vsel %vm2876_vm14, %v6174_v55, %v2956_v41  ;;  %v2954_v50 = vmul.f32 0.6931472, %v4463_v23  ;;  %4490 = vpow2.f32 %v2821_v5  ;;  %v2795_v29 = vmin.f32 %v5866_v34, 20.0  ;;  %v4469_v2 = vpop.eup %4468 }
 0x62d   : > { %v3257_v46 = vadd.f32 %v3256_v56, %v5765_v12  ;;  %v3231_v54 = vsub.f32 %v3147_v27, %v5805_v19  ;;  %v3149_v36 = vsub.f32 0.0, %v2988_v37  ;;  %v3819_v26 = vpack.c.bf16 %v4465_v1, %v4457_v10  ;;  %v4471_v3 = vpop.eup %4470 }
 0x62e   : > { %v2987_v28 = vsel %vm2875_vm15, %v6175_v33, %v2954_v50  ;;  %v2958_v11 = vmul.f32 0.6931472, %v4467_v22  ;;  %4492 = vpow2.f32 %v2823_v47  ;;  %v2847_v55 = vmul.f32 1.442695, %v2794_v32 }
 0x62f   : > { %v5886_v5 = vadd.f32 %v3257_v46, %v3227_v61  ;;  %v3233_v18 = vsub.f32 %v3149_v36, %v5811_v30  ;;  %3122 = vst [vmem:[%s5710_s30 + $0x54] sm:$0xff] %v3819_v26  ;;  %v3148_v12 = vsub.f32 0.0, %v2987_v28  ;;  %v3820_v41 = vpack.c.bf16 %v4469_v2, %v4461_v48  ;;  %v4473_v19 = vpop.eup %4472  ;;  %v6178_v61 = vld [vmem:[#allocation34_spill] sm:$0xff] }
 0x630   : > { %v2989_v10 = vsel %vm2877_vm1, %v6176_v60, %v2958_v11  ;;  %v2918_v23 = vmul.f32 0.6931472, %v4471_v3  ;;  %4494 = vpow2.f32 %v2833_v49  ;;  %v2849_v33 = vmul.f32 1.442695, %v2795_v29  ;;  %v4475_v56 = vpop.eup %4474 }
 0x631   : > { %v3232_v47 = vsub.f32 %v3148_v12, %v5819_v62  ;;  %3123 = vst [vmem:[%s5710_s30 + $0x5c] sm:$0xff] %v3820_v41  ;;  %v3150_v32 = vsub.f32 0.0, %v2989_v10  ;;  %vm2873_vm4 = vcmp.gt.f32.partialorder %v5680_v42, 20.0  ;;  %4496 = vpow2.f32 %v2835_v16  ;;  %v4477_v30 = vpop.eup %4476 }
 0x632   : > { %v2969_v48 = vsel %vm2857_vm2, %v6177_v51, %v2918_v23  ;;  %v3202_v60 = vmul.f32 %v3174_v57, %v6178_v61  ;;  %4498 = vpow2.f32 %v2847_v55  ;;  %v2950_v49 = vmul.f32 0.6931472, %v4475_v56  ;;  %v4479_v27 = vpop.eup %4478 }
 0x633   : > { %v3265_v1 = vadd.f32 %v3232_v47, %v3231_v54  ;;  %v3234_v62 = vsub.f32 %v3150_v32, %v5831_v59  ;;  %v3130_v37 = vsub.f32 0.0, %v2969_v48  ;;  %v3818_v50 = vpack.c.bf16 %v4477_v30, %v4477_v30 }
 0x634   : > { %v4481_v29 = vpop.eup %4480  ;;  %vm2858_vm5 = vcmp.gt.f32.partialorder %v5705_v53, 20.0  ;;  %v2920_v16 = vmul.f32 0.6931472, %v4479_v27  ;;  %4500 = vpow2.f32 %v2849_v33  ;;  %v2985_v58 = vsel %vm2873_vm4, %v5680_v42, %v2950_v49 }
 0x635   : > { %v4483_v57 = vpop.eup %4482  ;;  %v3266_v51 = vadd.f32 %v3265_v1, %v3233_v18  ;;  %v3214_v22 = vsub.f32 %v3130_v37, %v5838_v45  ;;  %3121 = vst.msk [vmem:[%s5710_s30 + $0x50] sm:$0xf] %vm3112_vm3, %v3818_v50  ;;  %v3809_v46 = vpack.c.bf16 %v4481_v29, %v4473_v19  ;;  %v3146_v59 = vsub.f32 0.0, %v2985_v58 }
 0x636   : > { %v4485_v54 = vpop.eup %4484  ;;  %v2970_v36 = vsel %vm2858_vm5, %v5705_v53, %v2920_v16  ;;  %v3187_v26 = vmul.f32 %v3159_v39, %v5687_v21  ;;  %vm2859_vm6 = vcmp.gt.f32.partialorder %v5718_v7, 20.0  ;;  %v2922_v2 = vmul.f32 0.6931472, %v4483_v57 }
 0x637   : > { %v4487_v42 = vpop.eup %4486  ;;  %v5915_v28 = vadd.f32 %v3266_v51, %v3234_v62  ;;  %3111 = vst [vmem:[%s5710_s30 + $0x10] sm:$0xff] %v3809_v46  ;;  %v3131_v45 = vsub.f32 0.0, %v2970_v36  ;;  %v3810_v11 = vpack.c.bf16 %v4485_v54, %v4485_v54  ;;  %v3241_v55 = vadd.f32 %v5735_v35, %v3214_v22  ;;  %v4552_v62 = vld [vmem:[%s5027_s19 + $0x58] sm:$0xff]  ;;  %v6180_v51 = vld [vmem:[#allocation25_spill] sm:$0xff]  ;;  %v4553_v46 = vld [vmem:[%s5027_s19 + $0x60] sm:$0xff] }
 0x638   : > { %v4489_v3 = vpop.eup %4488  ;;  %v2892_v18 = vadd.f32 1.0, %v4487_v42  ;;  %v2971_v53 = vsel %vm2859_vm6, %v5718_v7, %v2922_v2  ;;  %v5920_v12 = vsub.f32 %v3146_v59, %v3202_v60  ;;  %v6179_v21 = vsub.f32 1.0, %v5090_v52  ;;  %v6181_v54 = vld [vmem:[#allocation24_spill] sm:$0xff] }
 0x639   : > { %v4491_v25 = vpop.eup %4490  ;;  %v3215_v41 = vsub.f32 %v3131_v45, %v3187_v26  ;;  %3113 = vst.msk [vmem:[%s5710_s30 + $0x18] sm:$0xf] %vm3112_vm3, %v3810_v11  ;;  %v2908_v19 = vadd.f32 1.0, %v4489_v3  ;;  %v3132_v10 = vsub.f32 0.0, %v2971_v53  ;;  %v3165_v37 = vsub.f32 1.0, %v4552_v62  ;;  %v4554_v11 = vld [vmem:[%s5027_s19 + $0x90] sm:$0xff] }
 0x63a   : > { %v3188_v39 = vmul.f32 %v6179_v21, %v5696_v63  ;;  %4502 = vlog2.f32 %v2892_v18  ;;  %v2893_v23 = vadd.f32 1.0, %v4491_v25  ;;  %vm2864_vm7 = vcmp.gt.f32.partialorder %v5783_v17, 20.0  ;;  %v4555_v53 = vld [vmem:[%s5027_s19 + $0x98] sm:$0xff]  ;;  %v5939_v21 = vld [vmem:[%s5027_s19 + $0xd0] sm:$0xff] }
 0x63b   : > { %v4493_v33 = vpop.eup %4492  ;;  %4504 = vrcp.f32 %v2892_v18  ;;  %v3242_v56 = vadd.f32 %v3241_v55, %v3215_v41  ;;  %v3181_v22 = vsub.f32 1.0, %v6180_v51  ;;  %v3166_v59 = vsub.f32 1.0, %v4553_v46 }
 0x63c   : > { %v3216_v35 = vsub.f32 %v3132_v10, %v3188_v39  ;;  %4506 = vlog2.f32 %v2908_v19  ;;  %v2894_v7 = vadd.f32 1.0, %v4493_v33  ;;  %v3167_v36 = vsub.f32 1.0, %v6181_v54 }
 0x63d   : > { %v4495_v47 = vpop.eup %4494  ;;  %4508 = vrcp.f32 %v2908_v19  ;;  %v3193_v42 = vmul.f32 %v3165_v37, %v5758_v4  ;;  %v3172_v55 = vsub.f32 1.0, %v4554_v11  ;;  %v3173_v25 = vsub.f32 1.0, %v4555_v53 }
 0x63e   : > { %v3243_v32 = vsel %vm871_vm0, %v3216_v35, 0.0  ;;  %v4497_v30 = vpop.eup %4496  ;;  %4510 = vlog2.f32 %v2893_v23  ;;  %v2899_v48 = vadd.f32 1.0, %v4495_v47  ;;  %v3180_v39 = vsub.f32 1.0, %v5939_v21 }
 0x63f   : > { %v3244_v61 = vadd.f32 %v3243_v32, %v3242_v56  ;;  %v4499_v52 = vpop.eup %4498  ;;  %4512 = vrcp.f32 %v2893_v23  ;;  %v2900_v63 = vadd.f32 1.0, %v4497_v30  ;;  %vm2880_vm8 = vcmp.gt.f32.partialorder %v5789_v8, 20.0 }
 0x640   : > { %4514 = vlog2.f32 %v2894_v7  ;;  %v2906_v49 = vadd.f32 1.0, %v4499_v52  ;;  %vm2865_vm9 = vcmp.gt.f32.partialorder %v5792_v9, 20.0  ;;  %v3194_v35 = vmul.f32 %v3166_v59, %v5768_v31 }
 0x641   : > { %3245 = vadd.xlane.f32.xlu1 %v3244_v61  ;;  %v4501_v60 = vpop.eup %4500  ;;  %4516 = vrcp.f32 %v2894_v7  ;;  %vm2866_vm11 = vcmp.gt.f32.partialorder %v5814_v13, 20.0  ;;  %v3195_v52 = vmul.f32 %v3167_v36, %v5786_v43  ;;  %vm2871_vm12 = vcmp.gt.f32.partialorder %v5826_v20, 20.0 }
 0x642   : > { %4518 = vlog2.f32 %v2899_v48  ;;  %v2907_v27 = vadd.f32 1.0, %v4501_v60  ;;  %v3200_v60 = vmul.f32 %v3172_v55, %v5795_v40  ;;  %vm2872_vm13 = vcmp.gt.f32.partialorder %v5845_v24, 20.0 }
 0x643   : > { %4520 = vrcp.f32 %v2899_v48  ;;  %vm2878_vm14 = vcmp.gt.f32.partialorder %v5854_v38, 20.0  ;;  %vm2879_vm15 = vcmp.gt.f32.partialorder %v5866_v34, 20.0 }
 0x644   : > { %4522 = vlog2.f32 %v2900_v63 }
 0x645   : > { %4524 = vrcp.f32 %v2900_v63 }
 0x646   : > { %4526 = vlog2.f32 %v2906_v49 }
 0x647   : > { %v4503_v1 = vpop.eup %4502  ;;  %4528 = vrcp.f32 %v2906_v49 }
 0x648   : > { %v4505_v50 = vpop.eup %4504  ;;  %v2932_v29 = vmul.f32 0.6931472, %v4503_v1  ;;  %4530 = vlog2.f32 %v2907_v27 }
 0x649   : > { %v4507_v16 = vpop.eup %4506  ;;  %4532 = vrcp.f32 %v2907_v27  ;;  %v3201_v27 = vmul.f32 %v3173_v25, %v5834_v14  ;;  %v3208_v25 = vmul.f32 %v3180_v39, %v5850_v6 }
 0x64a   : > { %v4509_v58 = vpop.eup %4508  ;;  %v2976_v57 = vsel %vm2864_vm7, %v5783_v17, %v2932_v29  ;;  %v4556_v17 = vld [vmem:[%s5027_s19 + $0xc8] sm:$0xff]  ;;  %v2964_v7 = vmul.f32 0.6931472, %v4507_v16  ;;  %s4668_s19 = scalar_lea.vmem %s4667_s4, 7168 }
 0x64b   : > { %v4511_v26 = vpop.eup %4510  ;;  %v3137_v2 = vsub.f32 0.0, %v2976_v57  ;;  %v3822_v45 = vpack.c.bf16 %v4509_v58, %v4509_v58  ;;  %v3179_v41 = vsub.f32 1.0, %v4556_v17  ;;  %p4670_p7 = scmp.lt.s32.totalorder %s4668_s19, %s4662_s24 }
 0x64c   : > { %v4513_v3 = vpop.eup %4512  ;;  %v2934_v18 = vmul.f32 0.6931472, %v4511_v26  ;;  %v2992_v40 = vsel %vm2880_vm8, %v5789_v8, %v2964_v7 }
 0x64d   : > { %v4515_v19 = vpop.eup %4514  ;;  %v3221_v10 = vsub.f32 %v3137_v2, %v3193_v42  ;;  %3125 = vst.msk [vmem:[%s5710_s30 + $0x6c] sm:$0xf] %vm3112_vm3, %v3822_v45  ;;  %v3813_v4 = vpack.c.bf16 %v4513_v3, %v4505_v50  ;;  %v3209_v3 = vmul.f32 %v3181_v22, %v5761_v0  ;;  %p4671_p8 = por %p4670_p7, %p4669_p4 }
 0x64e   : > { %v4517_v23 = vpop.eup %4516  ;;  %v2977_v33 = vsel %vm2865_vm9, %v5792_v9, %v2934_v18  ;;  %v2936_v56 = vmul.f32 0.6931472, %v4515_v19 }
 0x64f   : > { %v4519_v47 = vpop.eup %4518  ;;  %3116 = vst [vmem:[%s5710_s30 + $0x2c] sm:$0xff] %v3813_v4  ;;  %v3138_v32 = vsub.f32 0.0, %v2977_v33  ;;  %v3814_v30 = vpack.c.bf16 %v4517_v23, %v4517_v23  ;;  %v3250_v48 = vadd.f32 %v5763_v15, %v3221_v10  ;;  %p4672_p11 = pnand %p4671_p8, %p4665_p13 }
 0x650   : > { %v4521_v61 = vpop.eup %4520  ;;  %v2946_v63 = vmul.f32 0.6931472, %v4519_v47  ;;  %v2978_v9 = vsel %vm2866_vm11, %v5814_v13, %v2936_v56 }
 0x651   : > { %v4523_v31 = vpop.eup %4522  ;;  %v3222_v49 = vsub.f32 %v3138_v32, %v3194_v35  ;;  %3117 = vst.msk [vmem:[%s5710_s30 + $0x34] sm:$0xf] %vm3112_vm3, %v3814_v30  ;;  %v3139_v1 = vsub.f32 0.0, %v2978_v9 }
 0x652   : > { %v4525_v62 = vpop.eup %4524  ;;  %v2983_v15 = vsel %vm2871_vm12, %v5826_v20, %v2946_v63  ;;  %v2948_v43 = vmul.f32 0.6931472, %v4523_v31  ;;  %v3207_v20 = vmul.f32 %v3179_v41, %v5842_v44 }
 0x653   : > { %v4527_v13 = vpop.eup %4526  ;;  %v3144_v37 = vsub.f32 0.0, %v2983_v15  ;;  %v3817_v50 = vpack.c.bf16 %v4525_v62, %v4521_v61  ;;  %v3223_v29 = vsub.f32 %v3139_v1, %v3195_v52  ;;  %v3251_v16 = vadd.f32 %v3250_v48, %v3222_v49 }
 0x654   : > { %v4529_v58 = vpop.eup %4528  ;;  %v2984_v14 = vsel %vm2872_vm13, %v5845_v24, %v2948_v43  ;;  %v2960_v57 = vmul.f32 0.6931472, %v4527_v13  ;;  %v3153_v24 = vsub.f32 0.0, %v2992_v40 }
 0x655   : > { %v4531_v46 = vpop.eup %4530  ;;  %v3228_v59 = vsub.f32 %v3144_v37, %v3200_v60  ;;  %3120 = vst [vmem:[%s5710_s30 + $0x48] sm:$0xff] %v3817_v50  ;;  %v3145_v54 = vsub.f32 0.0, %v2984_v14  ;;  %v3252_v8 = vsel %vm871_vm0, %v3223_v29, 0.0 }
 0x656   : > { %v4533_v36 = vpop.eup %4532  ;;  %v2990_v26 = vsel %vm2878_vm14, %v5854_v38, %v2960_v57  ;;  %v2962_v2 = vmul.f32 0.6931472, %v4531_v46  ;;  %v3253_v42 = vadd.f32 %v3252_v8, %v3251_v16  ;;  %v3237_v51 = vsub.f32 %v3153_v24, %v3209_v3 }
 0x657   : > { %v3229_v45 = vsub.f32 %v3145_v54, %v3201_v27  ;;  %v3151_v11 = vsub.f32 0.0, %v2990_v26  ;;  %v3821_v55 = vpack.c.bf16 %v4533_v36, %v4529_v58  ;;  %v3259_v44 = vadd.f32 %v5886_v5, %v3228_v59 }
 0x658   : > { %v2991_v18 = vsel %vm2879_vm15, %v5866_v34, %v2962_v2  ;;  %3254 = vadd.xlane.f32.xlu0 %v3253_v42  ;;  %v3261_v5 = vsel %vm871_vm0, %v5920_v12, 0.0  ;;  %v3270_v19 = vsel %vm871_vm0, %v3237_v51, 0.0 }
 0x659   : > { %v3235_v53 = vsub.f32 %v3151_v11, %v3207_v20  ;;  %3124 = vst [vmem:[%s5710_s30 + $0x64] sm:$0xff] %v3821_v55  ;;  %v3152_v38 = vsub.f32 0.0, %v2991_v18  ;;  %v3260_v17 = vadd.f32 %v3259_v44, %v3229_v45 }
 0x65b   : > { %v3236_v0 = vsub.f32 %v3152_v38, %v3208_v25  ;;  %v3262_v34 = vadd.f32 %v3261_v5, %v3260_v17  ;;  %v3268_v22 = vadd.f32 %v5915_v28, %v3235_v53 }
 0x65d   : > { %3263 = vadd.xlane.f32.xlu0 %v3262_v34  ;;  %v3269_v41 = vadd.f32 %v3268_v22, %v3236_v0 }
 0x65f   : > { %v3271_v10 = vadd.f32 %v3270_v19, %v3269_v41 }
 0x661   : > { %3272 = vadd.xlane.f32.xlu1 %v3271_v10 }
 0x662   : > { %4675 = shalt.err (!%p4672_p11)
}
 0x663   : > { %s4676_s26 = scalar_lea.hbm %s5989_s20, 3584  ;;  %s4680_s27 = scalar_lea.hbm %s6089_s15, 7168 }
 0x664   : > { %p4677_p0 = scmp.ne.s32.totalorder %s5989_s20, %s4676_s26  ;;  %p4681_p3 = scmp.lt.s32.totalorder %s5989_s20, %s6089_s15 }
 0x665   : > { %p4682_p9 = scmp.lt.s32.totalorder %s4680_s27, %s4676_s26 }
 0x666   : > { %p4678_p2 = pnand %p4677_p0, %p4912_p5 }
 0x667   : > { %p4683_p10 = por %p4682_p9, %p4681_p3 }
 0x668   : > { %p4679_p1 = pneg %p4678_p2 }
 0x66a   : > { %p4684_p12 = pnand %p4683_p10, %p4679_p1 }
 0x66c   : > { %4687 = shalt.err (!%p4684_p12)
}
 0x66d   : > { %s4774_s4 = smov 896   ;;  %s4775_s24 = smov 56  }
 0x66e   : > { %s6182_s19 = scalar_lea.sflag [#allocation4], %s5010_s29  ;;  %s6183_s25 = smul.u32 1792, %s4895_s0 }
 0x66f   : > { %4057 = dma.vmem_to_hbm [thread:$0]  (%p4912_p5), %s5991_s21, 3584, %s5989_s20, %s6182_s19, %s4774_s4, %s4774_s4, %s4775_s24  }
 0x670   : > { %s6021_s26 = scalar_lea.hbm %s6090_s16, %s6183_s25  ;;  %s3381_s3 = sshll.u32 %s5710_s30, 4  ;;  %s6024_s3 = int_to_ptr.vmem [resolvable:$true] %s3381_s3 }
 0x671   : > { %s3340_s27 = scalar_lea.sflag [#allocation12], %s5010_s29  ;;  %s4688_s5 = scalar_lea.vmem %s6024_s3, 1792 }
 0x672   : > { %p4689_p13 = scmp.ne.s32.totalorder %s6024_s3, %s4688_s5  ;;  %s4776_s6 = smov [#allocation11]  }
 0x673   : > { %s4692_s21 = sshll.u32 %s4776_s6, 4  ;;  %s4693_s21 = int_to_ptr.vmem [resolvable:$false] %s4692_s21 }
 0x674   : > { %p4690_p4 = pnand %p4689_p13, %p4912_p5  ;;  %s4694_s0 = scalar_lea.vmem %s4693_s21, 3584 }
 0x675   : > { %p4695_p8 = scmp.lt.s32.totalorder %s6024_s3, %s4693_s21  ;;  %p4696_p11 = scmp.lt.s32.totalorder %s4694_s0, %s4688_s5 }
 0x676   : > { %p4691_p7 = pneg %p4690_p4 }
 0x677   : > { %p4697_p0 = por %p4696_p11, %p4695_p8 }
 0x679   : > { %p4698_p2 = pnand %p4697_p0, %p4691_p7 }
 0x67b   : > { %4701 = shalt.err (!%p4698_p2)
}
 0x67c   : > { %s4702_s30 = scalar_lea.hbm %s6021_s26, 1792  ;;  %s4706_s6 = scalar_lea.hbm %s6090_s16, 3584 }
 0x67d   : > { %p4703_p1 = scmp.ne.s32.totalorder %s6021_s26, %s4702_s30  ;;  %p4707_p10 = scmp.lt.s32.totalorder %s6021_s26, %s6090_s16 }
 0x67e   : > { %p4708_p12 = scmp.lt.s32.totalorder %s4706_s6, %s4702_s30 }
 0x67f   : > { %p4704_p3 = pnand %p4703_p1, %p4912_p5 }
 0x680   : > { %p4709_p13 = por %p4708_p12, %p4707_p10 }
 0x681   : > { %p4705_p9 = pneg %p4704_p3 }
 0x683   : > { %p4710_p4 = pnand %p4709_p13, %p4705_p9 }
 0x685   : > { %4713 = shalt.err (!%p4710_p4)
}
 0x686   : > { %s4777_s5 = smov 448   ;;  %s4778_s25 = smov 28  }
 0x687   : > { %4058 = dma.vmem_to_hbm [thread:$0]  (%p4912_p5), %s6024_s3, 1792, %s6021_s26, %s3340_s27, %s4777_s5, %s4777_s5, %s4778_s25  }
 0x688   : > { %s716_s21 = scalar_lea.vmem %s6091_s17, %s5193_s1 }
 0x6ca   : > { %v3246_v6 = vpop.xlane.xlu1 %3245 }
 0x6cb   : > { %3275 = vst.msk [vmem:[%s716_s21] sm:$0xff] %vm3274_vm10, %v3246_v6 }
 0x6e1   : > { %v3255_v28 = vpop.xlane.xlu0 %3254 }
 0x6e2   : > { %3276 = vst.msk [vmem:[%s716_s21 + $0x8] sm:$0xff] %vm3274_vm10, %v3255_v28 }
 0x6e6   : > { %v3264_v12 = vpop.xlane.xlu0 %3263 }
 0x6e7   : > { %3277 = vst.msk [vmem:[%s716_s21 + $0x10] sm:$0xff] %vm3274_vm10, %v3264_v12 }
 0x6ea   : > { %v3273_v21 = vpop.xlane.xlu1 %3272 }
 0x6eb   : > { %3278 = vst.msk [vmem:[%s716_s21 + $0x18] sm:$0xff] %vm3274_vm10, %v3273_v21 }
 0x6ec PF: > { %s6184_s2 = sld [smem:[#allocation20_spill]] }
 0x6ed   : > { %s6185_s29 = sld [smem:[#allocation18_spill]] }
 0x6f2   : > { %p4089_p5 = scmp.ge.s32.totalorder %s6184_s2, 2 }
 0x6f3   : > { %s3404_s3 = sand.u32 1, %s6185_s29  }
 0x6f4   : > { %p4075_p7 = pnand %p4089_p5, %p4916_p6  ;;  %s3405_s1 = scalar_lea.sflag [#allocation4], %s3404_s3 }
 0x6f6   : > { %p4076_p8 = pneg %p4075_p7 }
 0x6f8   : > { %4743 = dma.done.wait (%p4076_p8), %s3405_s1, 3584  }
 0x6f9   : > { %4745 = vsyncadd (%p4076_p8), %s3405_s1, 4294963712  ;;  %s3414_s27 = scalar_lea.sflag [#allocation12], %s3404_s3 }
 0x6fa   : > { %4747 = dma.done.wait (%p4076_p8), %s3414_s27, 1792  }
 0x6fb   : > { %4749 = vsyncadd (%p4076_p8), %s3414_s27, 4294965504  ;;  %s6187_s30 = sld [smem:[#allocation21_spill]]  ;;  %s6190_s27 = smov %s4756_s28 }
 0x6fc   : > { %s6188_s0 = sld [smem:[#allocation19_spill]] }
 0x6fd   : > { %s6189_s29 = sld [smem:[#allocation22_spill]] }
 0x701   : > { %p35_p11 = scmp.ge.s32.totalorder %s6187_s30, 4  }
 0x702   : > { %s6191_s28 = smov %s6188_s0 }
 0x703   :  { %37 = sbr.rel (!%p35_p11) target bundleno = 16 (0x10), region = 179 }
 0x708   :  { %3435 = vsyncpa [#allocation3], 1 }
 0x709   :  { %3437 = vsyncpa [#allocation3 + $0x1], 1 }
 0x70a   :  { %3438 = vsyncpa [#allocation6], 1 }
 0x70b   :  { %3439 = vsyncpa [#allocation9], 1 }
 0x70c   :  { %3440 = vsyncpa [#allocation4], 1 }
 0x70d   :  { %3442 = vsyncpa [#allocation4 + $0x1], 1 }
 0x70e   :  { %3443 = vsyncpa [#allocation12], 1 }
 0x70f   :  { %3445 = vsyncpa [#allocation12 + $0x1], 1 }

</bundles_post_ra>
